<compile_context>
chip_gen: v7x
topology: tpu7x:2x2x1
jax: 0.10.0
libtpu: 0.0.40
codegen_flags: <defaults>
</compile_context>

<pallas_src>
import math

import numpy as np
import jax
import jax.numpy as jnp
from jax.experimental import pallas as pl
from jax.experimental.pallas import tpu as pltpu


# ----------------------------------------------------------------------------
# Fused forward kernel (everything in VMEM)
# ----------------------------------------------------------------------------
def _make_fused_kernel(n_gather_layers, compute_dtype):
    """Fused kernel for `1 + n_gather_layers` conv blocks + conv_out."""

    def kernel(*refs):
        # refs = [x1p, w1] + [s_i, w_i] * n_gather_layers + [wout_tiled, gmat, out]
        x1p_ref, w1_ref = refs[0], refs[1]
        gather_refs = refs[2:2 + 2 * n_gather_layers]
        wout_ref = refs[2 + 2 * n_gather_layers]
        gmat_ref = refs[3 + 2 * n_gather_layers]
        out_ref = refs[-1]

        # --- conv block 1: im2col GEMM (bf16 MXU, f32 acc) + LeakyReLU(0.2) --
        y = jnp.dot(x1p_ref[...], w1_ref[...],
                    preferred_element_type=jnp.float32)
        y = jnp.where(y >= 0.0, y, 0.2 * y)                      # f32

        # --- conv blocks 2..n: per-tap accumulation, gather-as-matmul --------
        #   gathered_tap = S_tap @ y      (0/1 rows: stride-2 + pad-1 gather)
        #   acc         += gathered_tap @ W_tap
        for layer in range(n_gather_layers):
            s_ref = gather_refs[2 * layer]       # (16, M_out, M_in)
            w_ref = gather_refs[2 * layer + 1]   # (16, C_in,  C_out)
            y_op = y.astype(compute_dtype)
            acc = None
            for tap in range(16):
                gathered = jnp.dot(s_ref[tap], y_op,
                                   preferred_element_type=jnp.float32)
                part = jnp.dot(gathered.astype(compute_dtype), w_ref[tap],
                               preferred_element_type=jnp.float32)
                acc = part if acc is None else acc + part
            y = jnp.where(acc >= 0.0, acc, 0.2 * acc)            # f32

        # --- conv_out (4x4 "valid" on the 4x4 map): VPU multiply-reduce ------
        prod = y * wout_ref[...]                                  # (B*16, C) f32
        t = jnp.dot(gmat_ref[...], prod,                          # (B, C) f32
                    preferred_element_type=jnp.float32)
        out_ref[...] = jnp.sum(t, axis=-1, keepdims=True).astype(out_ref.dtype)

    return kernel


def _fused_forward(x1p, prep):
    n_gather = len(prep["s"])
    batch = prep["gmat"].shape[0]
    args = [x1p, prep["w1m"]]
    for s, w in zip(prep["s"], prep["wtap"]):
        args += [s, w]
    args += [prep["wout_tiled"], prep["gmat"]]
    kernel = _make_fused_kernel(n_gather, prep["w1m"].dtype)
    return pl.pallas_call(
        kernel,
        out_shape=jax.ShapeDtypeStruct((batch, 1), jnp.float32),
        in_specs=[pl.BlockSpec(memory_space=pltpu.MemorySpace.VMEM)] * len(args),
        out_specs=pl.BlockSpec(memory_space=pltpu.MemorySpace.VMEM),
    )(*args)


# ----------------------------------------------------------------------------
# Layer-1 im2col (4x4, stride 2, pad 1) — small one-time glue in the wrapper
# ----------------------------------------------------------------------------
def _im2col_k4s2p1(x_nhwc):
    B, H, W, C = x_nhwc.shape
    OH, OW = H // 2, W // 2
    xp = jnp.pad(x_nhwc, ((0, 0), (1, 1), (1, 1), (0, 0)))
    cols = []
    for kh in range(4):
        for kw in range(4):
            cols.append(xp[:, kh:kh + 2 * OH:2, kw:kw + 2 * OW:2, :])
    patches = jnp.stack(cols, axis=3)                  # (B, OH, OW, 16, C)
    return patches.reshape(B * OH * OW, 16 * C)


# ----------------------------------------------------------------------------
# Parameters (deterministic, shapes follow the nn.Module __init__)
# ----------------------------------------------------------------------------
def init_params(key, in_dim=3, n_feat=32, img_size=16):
    n_layers = int(math.log2(img_size) - 2)
    chans = [in_dim] + [n_feat // 2 ** (n_layers - 1 - i) for i in range(n_layers)]
    keys = jax.random.split(key, n_layers + 1)
    blocks = []
    for i in range(n_layers):
        ci, co = chans[i], chans[i + 1]
        bound = 1.0 / math.sqrt(ci * 16)
        blocks.append(jax.random.uniform(
            keys[i], (co, ci, 4, 4), jnp.float32, minval=-bound, maxval=bound))
    bound = 1.0 / math.sqrt(n_feat * 16)
    conv_out = jax.random.uniform(
        keys[-1], (1, n_feat, 4, 4), jnp.float32, minval=-bound, maxval=bound)
    return {"blocks": blocks, "conv_out": conv_out,
            "in_dim": in_dim, "img_size": img_size}


def _make_selection(batch, h_in, h_out):
    """0/1 gather matrices: s[tap, out_row, in_row] for 4x4/stride-2/pad-1."""
    s = np.zeros((16, batch * h_out * h_out, batch * h_in * h_in), np.float32)
    for kh in range(4):
        for kw in range(4):
            tap = kh * 4 + kw
            for b in range(batch):
                for oh in range(h_out):
                    for ow in range(h_out):
                        hi = 2 * oh - 1 + kh
                        wi = 2 * ow - 1 + kw
                        if 0 <= hi < h_in and 0 <= wi < h_in:
                            s[tap,
                              b * h_out * h_out + oh * h_out + ow,
                              b * h_in * h_in + hi * h_in + wi] = 1.0
    return s


def prepare_params(params, batch_size, compute_dtype=jnp.bfloat16):
    """One-time weight reshape / cast + constant gather matrices."""
    blocks = params["blocks"]
    n_layers = len(blocks)
    img_size = params["img_size"]
    sizes = [img_size // 2 ** (i + 1) for i in range(n_layers)]
    assert sizes[-1] == 4, "conv_out expects a 4x4 final feature map"

    # layer 1: (Co, Ci, 4, 4) -> (16*Ci, Co), (kh, kw, ci) ordering
    w1 = blocks[0]
    w1m = jnp.transpose(w1, (2, 3, 1, 0)).reshape(16 * w1.shape[1], w1.shape[0])
    w1m = w1m.astype(compute_dtype)

    s_list, wtap_list = [], []
    for i in range(1, n_layers):
        w = blocks[i]                                   # (Co, Ci, 4, 4)
        wtap = jnp.transpose(w, (2, 3, 1, 0)).reshape(16, w.shape[1], w.shape[0])
        wtap_list.append(wtap.astype(compute_dtype))
        s_list.append(jnp.asarray(
            _make_selection(batch_size, sizes[i - 1], sizes[i])).astype(compute_dtype))

    # conv_out: (1, C, 4, 4) -> (16, C) with row p = kh*4+kw, tiled over batch
    wout = params["conv_out"][0]
    w3 = jnp.transpose(wout, (1, 2, 0)).reshape(16, wout.shape[0])
    wout_tiled = jnp.tile(w3, (batch_size, 1)).astype(jnp.float32)   # (B*16, C)

    gmat = np.zeros((batch_size, batch_size * 16), np.float32)
    for b in range(batch_size):
        gmat[b, b * 16:(b + 1) * 16] = 1.0

    return {"w1m": w1m, "s": tuple(s_list), "wtap": tuple(wtap_list),
            "wout_tiled": wout_tiled, "gmat": jnp.asarray(gmat)}


# ----------------------------------------------------------------------------
# Forward pass (mirrors GIRAFFEDiscriminator.forward)
# ----------------------------------------------------------------------------
def giraffe_discriminator_forward(x_nchw, prep):
    assert x_nchw.shape[0] == prep["gmat"].shape[0], "batch != prepare_params batch"
    in_dim = prep["w1m"].shape[0] // 16
    if x_nchw.shape[1] != in_dim:
        x_nchw = x_nchw[:, :in_dim]                    # channel truncation
    x = jnp.transpose(x_nchw, (0, 2, 3, 1)).astype(jnp.float32)   # NHWC
    x1p = _im2col_k4s2p1(x).astype(prep["w1m"].dtype)  # (B*OH*OW, 16*Ci) bf16
    score = _fused_forward(x1p, prep)                  # single fused kernel
    return {"score": score}


if __name__ == "__main__":
    key = jax.random.PRNGKey(0)
    k_x, k_p = jax.random.split(key)

    # Small config consistent with the module: in_dim=3, n_feat=32, img_size=16
    # (n_layers = log2(16) - 2 = 2).  Input has 4 channels to exercise the
    # channel-truncation branch, exactly as the PyTorch forward does.
    x = jax.random.normal(k_x, (2, 4, 16, 16), jnp.float32)   # NCHW
    params = init_params(k_p, in_dim=3, n_feat=32, img_size=16)
    prep = prepare_params(params, batch_size=2)

    fwd = jax.jit(giraffe_discriminator_forward)
    out = fwd(x, prep)
    score = jax.block_until_ready(out["score"])
    assert score.shape == (2, 1) and score.dtype == jnp.float32
    assert bool(jnp.all(jnp.isfinite(score)))
    print("KERNEL_OK")
</pallas_src>

<mosaic_0001>
module attributes {stable_mosaic.version = 11 : i64} {
  func.func @kernel(%arg0: memref<128x48xbf16, #tpu.memory_space<vmem>>, %arg1: memref<48x16xbf16, #tpu.memory_space<vmem>>, %arg2: memref<16x32x128xbf16, #tpu.memory_space<vmem>>, %arg3: memref<16x16x32xbf16, #tpu.memory_space<vmem>>, %arg4: memref<32x32xf32, #tpu.memory_space<vmem>>, %arg5: memref<2x32xf32, #tpu.memory_space<vmem>>, %arg6: memref<2x1xf32, #tpu.memory_space<vmem>>) attributes {dimension_semantics = [], scalar_prefetch = 0 : i64, scratch_operands = 0 : i64, tpu.core_type = #tpu.core_type<tc>} {
    %c0 = arith.constant 0 : index
    %c0_0 = arith.constant 0 : index
    %0 = vector.load %arg0[%c0, %c0_0] : memref<128x48xbf16, #tpu.memory_space<vmem>>, vector<128x48xbf16>
    %c0_1 = arith.constant 0 : index
    %c0_2 = arith.constant 0 : index
    %1 = vector.load %arg1[%c0_1, %c0_2] : memref<48x16xbf16, #tpu.memory_space<vmem>>, vector<48x16xbf16>
    %cst = arith.constant dense<0.000000e+00> : vector<128x16xf32>
    %2 = tpu.matmul %0, %1, %cst {dimension_numbers = #tpu.dot_dimension_numbers<[1], [0], [0], [1], [0, 0, 1, 1], [], []>} : vector<128x48xbf16>, vector<48x16xbf16>, vector<128x16xf32> -> vector<128x16xf32>
    %cst_3 = arith.constant 0.000000e+00 : f32
    %3 = vector.broadcast %cst_3 : f32 to vector<128x16xf32>
    %4 = arith.cmpf oge, %2, %3 : vector<128x16xf32>
    %cst_4 = arith.constant 2.000000e-01 : f32
    %5 = vector.broadcast %cst_4 : f32 to vector<128x16xf32>
    %6 = arith.mulf %5, %2 : vector<128x16xf32>
    %7 = arith.select %4, %2, %6 : vector<128x16xi1>, vector<128x16xf32>
    %8 = arith.truncf %7 : vector<128x16xf32> to vector<128x16xbf16>
    %c0_5 = arith.constant 0 : index
    %c0_6 = arith.constant 0 : index
    %c0_7 = arith.constant 0 : index
    %9 = vector.load %arg2[%c0_5, %c0_6, %c0_7] : memref<16x32x128xbf16, #tpu.memory_space<vmem>>, vector<1x32x128xbf16>
    %10 = vector.shape_cast %9 : vector<1x32x128xbf16> to vector<32x128xbf16>
    %cst_8 = arith.constant dense<0.000000e+00> : vector<32x16xf32>
    %11 = tpu.matmul %10, %8, %cst_8 {dimension_numbers = #tpu.dot_dimension_numbers<[1], [0], [0], [1], [0, 0, 1, 1], [], []>} : vector<32x128xbf16>, vector<128x16xbf16>, vector<32x16xf32> -> vector<32x16xf32>
    %12 = arith.truncf %11 : vector<32x16xf32> to vector<32x16xbf16>
    %c0_9 = arith.constant 0 : index
    %c0_10 = arith.constant 0 : index
    %c0_11 = arith.constant 0 : index
    %13 = vector.load %arg3[%c0_9, %c0_10, %c0_11] : memref<16x16x32xbf16, #tpu.memory_space<vmem>>, vector<1x16x32xbf16>
    %14 = vector.shape_cast %13 : vector<1x16x32xbf16> to vector<16x32xbf16>
    %cst_12 = arith.constant dense<0.000000e+00> : vector<32x32xf32>
    %15 = tpu.matmul %12, %14, %cst_12 {dimension_numbers = #tpu.dot_dimension_numbers<[1], [0], [0], [1], [0, 0, 1, 1], [], []>} : vector<32x16xbf16>, vector<16x32xbf16>, vector<32x32xf32> -> vector<32x32xf32>
    %c1 = arith.constant 1 : index
    %c0_13 = arith.constant 0 : index
    %c0_14 = arith.constant 0 : index
    %16 = vector.load %arg2[%c1, %c0_13, %c0_14] : memref<16x32x128xbf16, #tpu.memory_space<vmem>>, vector<1x32x128xbf16>
    %17 = vector.shape_cast %16 : vector<1x32x128xbf16> to vector<32x128xbf16>
    %cst_15 = arith.constant dense<0.000000e+00> : vector<32x16xf32>
    %18 = tpu.matmul %17, %8, %cst_15 {dimension_numbers = #tpu.dot_dimension_numbers<[1], [0], [0], [1], [0, 0, 1, 1], [], []>} : vector<32x128xbf16>, vector<128x16xbf16>, vector<32x16xf32> -> vector<32x16xf32>
    %19 = arith.truncf %18 : vector<32x16xf32> to vector<32x16xbf16>
    %c1_16 = arith.constant 1 : index
    %c0_17 = arith.constant 0 : index
    %c0_18 = arith.constant 0 : index
    %20 = vector.load %arg3[%c1_16, %c0_17, %c0_18] : memref<16x16x32xbf16, #tpu.memory_space<vmem>>, vector<1x16x32xbf16>
    %21 = vector.shape_cast %20 : vector<1x16x32xbf16> to vector<16x32xbf16>
    %cst_19 = arith.constant dense<0.000000e+00> : vector<32x32xf32>
    %22 = tpu.matmul %19, %21, %cst_19 {dimension_numbers = #tpu.dot_dimension_numbers<[1], [0], [0], [1], [0, 0, 1, 1], [], []>} : vector<32x16xbf16>, vector<16x32xbf16>, vector<32x32xf32> -> vector<32x32xf32>
    %23 = arith.addf %15, %22 : vector<32x32xf32>
    %c2 = arith.constant 2 : index
    %c0_20 = arith.constant 0 : index
    %c0_21 = arith.constant 0 : index
    %24 = vector.load %arg2[%c2, %c0_20, %c0_21] : memref<16x32x128xbf16, #tpu.memory_space<vmem>>, vector<1x32x128xbf16>
    %25 = vector.shape_cast %24 : vector<1x32x128xbf16> to vector<32x128xbf16>
    %cst_22 = arith.constant dense<0.000000e+00> : vector<32x16xf32>
    %26 = tpu.matmul %25, %8, %cst_22 {dimension_numbers = #tpu.dot_dimension_numbers<[1], [0], [0], [1], [0, 0, 1, 1], [], []>} : vector<32x128xbf16>, vector<128x16xbf16>, vector<32x16xf32> -> vector<32x16xf32>
    %27 = arith.truncf %26 : vector<32x16xf32> to vector<32x16xbf16>
    %c2_23 = arith.constant 2 : index
    %c0_24 = arith.constant 0 : index
    %c0_25 = arith.constant 0 : index
    %28 = vector.load %arg3[%c2_23, %c0_24, %c0_25] : memref<16x16x32xbf16, #tpu.memory_space<vmem>>, vector<1x16x32xbf16>
    %29 = vector.shape_cast %28 : vector<1x16x32xbf16> to vector<16x32xbf16>
    %cst_26 = arith.constant dense<0.000000e+00> : vector<32x32xf32>
    %30 = tpu.matmul %27, %29, %cst_26 {dimension_numbers = #tpu.dot_dimension_numbers<[1], [0], [0], [1], [0, 0, 1, 1], [], []>} : vector<32x16xbf16>, vector<16x32xbf16>, vector<32x32xf32> -> vector<32x32xf32>
    %31 = arith.addf %23, %30 : vector<32x32xf32>
    %c3 = arith.constant 3 : index
    %c0_27 = arith.constant 0 : index
    %c0_28 = arith.constant 0 : index
    %32 = vector.load %arg2[%c3, %c0_27, %c0_28] : memref<16x32x128xbf16, #tpu.memory_space<vmem>>, vector<1x32x128xbf16>
    %33 = vector.shape_cast %32 : vector<1x32x128xbf16> to vector<32x128xbf16>
    %cst_29 = arith.constant dense<0.000000e+00> : vector<32x16xf32>
    %34 = tpu.matmul %33, %8, %cst_29 {dimension_numbers = #tpu.dot_dimension_numbers<[1], [0], [0], [1], [0, 0, 1, 1], [], []>} : vector<32x128xbf16>, vector<128x16xbf16>, vector<32x16xf32> -> vector<32x16xf32>
    %35 = arith.truncf %34 : vector<32x16xf32> to vector<32x16xbf16>
    %c3_30 = arith.constant 3 : index
    %c0_31 = arith.constant 0 : index
    %c0_32 = arith.constant 0 : index
    %36 = vector.load %arg3[%c3_30, %c0_31, %c0_32] : memref<16x16x32xbf16, #tpu.memory_space<vmem>>, vector<1x16x32xbf16>
    %37 = vector.shape_cast %36 : vector<1x16x32xbf16> to vector<16x32xbf16>
    %cst_33 = arith.constant dense<0.000000e+00> : vector<32x32xf32>
    %38 = tpu.matmul %35, %37, %cst_33 {dimension_numbers = #tpu.dot_dimension_numbers<[1], [0], [0], [1], [0, 0, 1, 1], [], []>} : vector<32x16xbf16>, vector<16x32xbf16>, vector<32x32xf32> -> vector<32x32xf32>
    %39 = arith.addf %31, %38 : vector<32x32xf32>
    %c4 = arith.constant 4 : index
    %c0_34 = arith.constant 0 : index
    %c0_35 = arith.constant 0 : index
    %40 = vector.load %arg2[%c4, %c0_34, %c0_35] : memref<16x32x128xbf16, #tpu.memory_space<vmem>>, vector<1x32x128xbf16>
    %41 = vector.shape_cast %40 : vector<1x32x128xbf16> to vector<32x128xbf16>
    %cst_36 = arith.constant dense<0.000000e+00> : vector<32x16xf32>
    %42 = tpu.matmul %41, %8, %cst_36 {dimension_numbers = #tpu.dot_dimension_numbers<[1], [0], [0], [1], [0, 0, 1, 1], [], []>} : vector<32x128xbf16>, vector<128x16xbf16>, vector<32x16xf32> -> vector<32x16xf32>
    %43 = arith.truncf %42 : vector<32x16xf32> to vector<32x16xbf16>
    %c4_37 = arith.constant 4 : index
    %c0_38 = arith.constant 0 : index
    %c0_39 = arith.constant 0 : index
    %44 = vector.load %arg3[%c4_37, %c0_38, %c0_39] : memref<16x16x32xbf16, #tpu.memory_space<vmem>>, vector<1x16x32xbf16>
    %45 = vector.shape_cast %44 : vector<1x16x32xbf16> to vector<16x32xbf16>
    %cst_40 = arith.constant dense<0.000000e+00> : vector<32x32xf32>
    %46 = tpu.matmul %43, %45, %cst_40 {dimension_numbers = #tpu.dot_dimension_numbers<[1], [0], [0], [1], [0, 0, 1, 1], [], []>} : vector<32x16xbf16>, vector<16x32xbf16>, vector<32x32xf32> -> vector<32x32xf32>
    %47 = arith.addf %39, %46 : vector<32x32xf32>
    %c5 = arith.constant 5 : index
    %c0_41 = arith.constant 0 : index
    %c0_42 = arith.constant 0 : index
    %48 = vector.load %arg2[%c5, %c0_41, %c0_42] : memref<16x32x128xbf16, #tpu.memory_space<vmem>>, vector<1x32x128xbf16>
    %49 = vector.shape_cast %48 : vector<1x32x128xbf16> to vector<32x128xbf16>
    %cst_43 = arith.constant dense<0.000000e+00> : vector<32x16xf32>
    %50 = tpu.matmul %49, %8, %cst_43 {dimension_numbers = #tpu.dot_dimension_numbers<[1], [0], [0], [1], [0, 0, 1, 1], [], []>} : vector<32x128xbf16>, vector<128x16xbf16>, vector<32x16xf32> -> vector<32x16xf32>
    %51 = arith.truncf %50 : vector<32x16xf32> to vector<32x16xbf16>
    %c5_44 = arith.constant 5 : index
    %c0_45 = arith.constant 0 : index
    %c0_46 = arith.constant 0 : index
    %52 = vector.load %arg3[%c5_44, %c0_45, %c0_46] : memref<16x16x32xbf16, #tpu.memory_space<vmem>>, vector<1x16x32xbf16>
    %53 = vector.shape_cast %52 : vector<1x16x32xbf16> to vector<16x32xbf16>
    %cst_47 = arith.constant dense<0.000000e+00> : vector<32x32xf32>
    %54 = tpu.matmul %51, %53, %cst_47 {dimension_numbers = #tpu.dot_dimension_numbers<[1], [0], [0], [1], [0, 0, 1, 1], [], []>} : vector<32x16xbf16>, vector<16x32xbf16>, vector<32x32xf32> -> vector<32x32xf32>
    %55 = arith.addf %47, %54 : vector<32x32xf32>
    %c6 = arith.constant 6 : index
    %c0_48 = arith.constant 0 : index
    %c0_49 = arith.constant 0 : index
    %56 = vector.load %arg2[%c6, %c0_48, %c0_49] : memref<16x32x128xbf16, #tpu.memory_space<vmem>>, vector<1x32x128xbf16>
    %57 = vector.shape_cast %56 : vector<1x32x128xbf16> to vector<32x128xbf16>
    %cst_50 = arith.constant dense<0.000000e+00> : vector<32x16xf32>
    %58 = tpu.matmul %57, %8, %cst_50 {dimension_numbers = #tpu.dot_dimension_numbers<[1], [0], [0], [1], [0, 0, 1, 1], [], []>} : vector<32x128xbf16>, vector<128x16xbf16>, vector<32x16xf32> -> vector<32x16xf32>
    %59 = arith.truncf %58 : vector<32x16xf32> to vector<32x16xbf16>
    %c6_51 = arith.constant 6 : index
    %c0_52 = arith.constant 0 : index
    %c0_53 = arith.constant 0 : index
    %60 = vector.load %arg3[%c6_51, %c0_52, %c0_53] : memref<16x16x32xbf16, #tpu.memory_space<vmem>>, vector<1x16x32xbf16>
    %61 = vector.shape_cast %60 : vector<1x16x32xbf16> to vector<16x32xbf16>
    %cst_54 = arith.constant dense<0.000000e+00> : vector<32x32xf32>
    %62 = tpu.matmul %59, %61, %cst_54 {dimension_numbers = #tpu.dot_dimension_numbers<[1], [0], [0], [1], [0, 0, 1, 1], [], []>} : vector<32x16xbf16>, vector<16x32xbf16>, vector<32x32xf32> -> vector<32x32xf32>
    %63 = arith.addf %55, %62 : vector<32x32xf32>
    %c7 = arith.constant 7 : index
    %c0_55 = arith.constant 0 : index
    %c0_56 = arith.constant 0 : index
    %64 = vector.load %arg2[%c7, %c0_55, %c0_56] : memref<16x32x128xbf16, #tpu.memory_space<vmem>>, vector<1x32x128xbf16>
    %65 = vector.shape_cast %64 : vector<1x32x128xbf16> to vector<32x128xbf16>
    %cst_57 = arith.constant dense<0.000000e+00> : vector<32x16xf32>
    %66 = tpu.matmul %65, %8, %cst_57 {dimension_numbers = #tpu.dot_dimension_numbers<[1], [0], [0], [1], [0, 0, 1, 1], [], []>} : vector<32x128xbf16>, vector<128x16xbf16>, vector<32x16xf32> -> vector<32x16xf32>
    %67 = arith.truncf %66 : vector<32x16xf32> to vector<32x16xbf16>
    %c7_58 = arith.constant 7 : index
    %c0_59 = arith.constant 0 : index
    %c0_60 = arith.constant 0 : index
    %68 = vector.load %arg3[%c7_58, %c0_59, %c0_60] : memref<16x16x32xbf16, #tpu.memory_space<vmem>>, vector<1x16x32xbf16>
    %69 = vector.shape_cast %68 : vector<1x16x32xbf16> to vector<16x32xbf16>
    %cst_61 = arith.constant dense<0.000000e+00> : vector<32x32xf32>
    %70 = tpu.matmul %67, %69, %cst_61 {dimension_numbers = #tpu.dot_dimension_numbers<[1], [0], [0], [1], [0, 0, 1, 1], [], []>} : vector<32x16xbf16>, vector<16x32xbf16>, vector<32x32xf32> -> vector<32x32xf32>
    %71 = arith.addf %63, %70 : vector<32x32xf32>
    %c8 = arith.constant 8 : index
    %c0_62 = arith.constant 0 : index
    %c0_63 = arith.constant 0 : index
    %72 = vector.load %arg2[%c8, %c0_62, %c0_63] : memref<16x32x128xbf16, #tpu.memory_space<vmem>>, vector<1x32x128xbf16>
    %73 = vector.shape_cast %72 : vector<1x32x128xbf16> to vector<32x128xbf16>
    %cst_64 = arith.constant dense<0.000000e+00> : vector<32x16xf32>
    %74 = tpu.matmul %73, %8, %cst_64 {dimension_numbers = #tpu.dot_dimension_numbers<[1], [0], [0], [1], [0, 0, 1, 1], [], []>} : vector<32x128xbf16>, vector<128x16xbf16>, vector<32x16xf32> -> vector<32x16xf32>
    %75 = arith.truncf %74 : vector<32x16xf32> to vector<32x16xbf16>
    %c8_65 = arith.constant 8 : index
    %c0_66 = arith.constant 0 : index
    %c0_67 = arith.constant 0 : index
    %76 = vector.load %arg3[%c8_65, %c0_66, %c0_67] : memref<16x16x32xbf16, #tpu.memory_space<vmem>>, vector<1x16x32xbf16>
    %77 = vector.shape_cast %76 : vector<1x16x32xbf16> to vector<16x32xbf16>
    %cst_68 = arith.constant dense<0.000000e+00> : vector<32x32xf32>
    %78 = tpu.matmul %75, %77, %cst_68 {dimension_numbers = #tpu.dot_dimension_numbers<[1], [0], [0], [1], [0, 0, 1, 1], [], []>} : vector<32x16xbf16>, vector<16x32xbf16>, vector<32x32xf32> -> vector<32x32xf32>
    %79 = arith.addf %71, %78 : vector<32x32xf32>
    %c9 = arith.constant 9 : index
    %c0_69 = arith.constant 0 : index
    %c0_70 = arith.constant 0 : index
    %80 = vector.load %arg2[%c9, %c0_69, %c0_70] : memref<16x32x128xbf16, #tpu.memory_space<vmem>>, vector<1x32x128xbf16>
    %81 = vector.shape_cast %80 : vector<1x32x128xbf16> to vector<32x128xbf16>
    %cst_71 = arith.constant dense<0.000000e+00> : vector<32x16xf32>
    %82 = tpu.matmul %81, %8, %cst_71 {dimension_numbers = #tpu.dot_dimension_numbers<[1], [0], [0], [1], [0, 0, 1, 1], [], []>} : vector<32x128xbf16>, vector<128x16xbf16>, vector<32x16xf32> -> vector<32x16xf32>
    %83 = arith.truncf %82 : vector<32x16xf32> to vector<32x16xbf16>
    %c9_72 = arith.constant 9 : index
    %c0_73 = arith.constant 0 : index
    %c0_74 = arith.constant 0 : index
    %84 = vector.load %arg3[%c9_72, %c0_73, %c0_74] : memref<16x16x32xbf16, #tpu.memory_space<vmem>>, vector<1x16x32xbf16>
    %85 = vector.shape_cast %84 : vector<1x16x32xbf16> to vector<16x32xbf16>
    %cst_75 = arith.constant dense<0.000000e+00> : vector<32x32xf32>
    %86 = tpu.matmul %83, %85, %cst_75 {dimension_numbers = #tpu.dot_dimension_numbers<[1], [0], [0], [1], [0, 0, 1, 1], [], []>} : vector<32x16xbf16>, vector<16x32xbf16>, vector<32x32xf32> -> vector<32x32xf32>
    %87 = arith.addf %79, %86 : vector<32x32xf32>
    %c10 = arith.constant 10 : index
    %c0_76 = arith.constant 0 : index
    %c0_77 = arith.constant 0 : index
    %88 = vector.load %arg2[%c10, %c0_76, %c0_77] : memref<16x32x128xbf16, #tpu.memory_space<vmem>>, vector<1x32x128xbf16>
    %89 = vector.shape_cast %88 : vector<1x32x128xbf16> to vector<32x128xbf16>
    %cst_78 = arith.constant dense<0.000000e+00> : vector<32x16xf32>
    %90 = tpu.matmul %89, %8, %cst_78 {dimension_numbers = #tpu.dot_dimension_numbers<[1], [0], [0], [1], [0, 0, 1, 1], [], []>} : vector<32x128xbf16>, vector<128x16xbf16>, vector<32x16xf32> -> vector<32x16xf32>
    %91 = arith.truncf %90 : vector<32x16xf32> to vector<32x16xbf16>
    %c10_79 = arith.constant 10 : index
    %c0_80 = arith.constant 0 : index
    %c0_81 = arith.constant 0 : index
    %92 = vector.load %arg3[%c10_79, %c0_80, %c0_81] : memref<16x16x32xbf16, #tpu.memory_space<vmem>>, vector<1x16x32xbf16>
    %93 = vector.shape_cast %92 : vector<1x16x32xbf16> to vector<16x32xbf16>
    %cst_82 = arith.constant dense<0.000000e+00> : vector<32x32xf32>
    %94 = tpu.matmul %91, %93, %cst_82 {dimension_numbers = #tpu.dot_dimension_numbers<[1], [0], [0], [1], [0, 0, 1, 1], [], []>} : vector<32x16xbf16>, vector<16x32xbf16>, vector<32x32xf32> -> vector<32x32xf32>
    %95 = arith.addf %87, %94 : vector<32x32xf32>
    %c11 = arith.constant 11 : index
    %c0_83 = arith.constant 0 : index
    %c0_84 = arith.constant 0 : index
    %96 = vector.load %arg2[%c11, %c0_83, %c0_84] : memref<16x32x128xbf16, #tpu.memory_space<vmem>>, vector<1x32x128xbf16>
    %97 = vector.shape_cast %96 : vector<1x32x128xbf16> to vector<32x128xbf16>
    %cst_85 = arith.constant dense<0.000000e+00> : vector<32x16xf32>
    %98 = tpu.matmul %97, %8, %cst_85 {dimension_numbers = #tpu.dot_dimension_numbers<[1], [0], [0], [1], [0, 0, 1, 1], [], []>} : vector<32x128xbf16>, vector<128x16xbf16>, vector<32x16xf32> -> vector<32x16xf32>
    %99 = arith.truncf %98 : vector<32x16xf32> to vector<32x16xbf16>
    %c11_86 = arith.constant 11 : index
    %c0_87 = arith.constant 0 : index
    %c0_88 = arith.constant 0 : index
    %100 = vector.load %arg3[%c11_86, %c0_87, %c0_88] : memref<16x16x32xbf16, #tpu.memory_space<vmem>>, vector<1x16x32xbf16>
    %101 = vector.shape_cast %100 : vector<1x16x32xbf16> to vector<16x32xbf16>
    %cst_89 = arith.constant dense<0.000000e+00> : vector<32x32xf32>
    %102 = tpu.matmul %99, %101, %cst_89 {dimension_numbers = #tpu.dot_dimension_numbers<[1], [0], [0], [1], [0, 0, 1, 1], [], []>} : vector<32x16xbf16>, vector<16x32xbf16>, vector<32x32xf32> -> vector<32x32xf32>
    %103 = arith.addf %95, %102 : vector<32x32xf32>
    %c12 = arith.constant 12 : index
    %c0_90 = arith.constant 0 : index
    %c0_91 = arith.constant 0 : index
    %104 = vector.load %arg2[%c12, %c0_90, %c0_91] : memref<16x32x128xbf16, #tpu.memory_space<vmem>>, vector<1x32x128xbf16>
    %105 = vector.shape_cast %104 : vector<1x32x128xbf16> to vector<32x128xbf16>
    %cst_92 = arith.constant dense<0.000000e+00> : vector<32x16xf32>
    %106 = tpu.matmul %105, %8, %cst_92 {dimension_numbers = #tpu.dot_dimension_numbers<[1], [0], [0], [1], [0, 0, 1, 1], [], []>} : vector<32x128xbf16>, vector<128x16xbf16>, vector<32x16xf32> -> vector<32x16xf32>
    %107 = arith.truncf %106 : vector<32x16xf32> to vector<32x16xbf16>
    %c12_93 = arith.constant 12 : index
    %c0_94 = arith.constant 0 : index
    %c0_95 = arith.constant 0 : index
    %108 = vector.load %arg3[%c12_93, %c0_94, %c0_95] : memref<16x16x32xbf16, #tpu.memory_space<vmem>>, vector<1x16x32xbf16>
    %109 = vector.shape_cast %108 : vector<1x16x32xbf16> to vector<16x32xbf16>
    %cst_96 = arith.constant dense<0.000000e+00> : vector<32x32xf32>
    %110 = tpu.matmul %107, %109, %cst_96 {dimension_numbers = #tpu.dot_dimension_numbers<[1], [0], [0], [1], [0, 0, 1, 1], [], []>} : vector<32x16xbf16>, vector<16x32xbf16>, vector<32x32xf32> -> vector<32x32xf32>
    %111 = arith.addf %103, %110 : vector<32x32xf32>
    %c13 = arith.constant 13 : index
    %c0_97 = arith.constant 0 : index
    %c0_98 = arith.constant 0 : index
    %112 = vector.load %arg2[%c13, %c0_97, %c0_98] : memref<16x32x128xbf16, #tpu.memory_space<vmem>>, vector<1x32x128xbf16>
    %113 = vector.shape_cast %112 : vector<1x32x128xbf16> to vector<32x128xbf16>
    %cst_99 = arith.constant dense<0.000000e+00> : vector<32x16xf32>
    %114 = tpu.matmul %113, %8, %cst_99 {dimension_numbers = #tpu.dot_dimension_numbers<[1], [0], [0], [1], [0, 0, 1, 1], [], []>} : vector<32x128xbf16>, vector<128x16xbf16>, vector<32x16xf32> -> vector<32x16xf32>
    %115 = arith.truncf %114 : vector<32x16xf32> to vector<32x16xbf16>
    %c13_100 = arith.constant 13 : index
    %c0_101 = arith.constant 0 : index
    %c0_102 = arith.constant 0 : index
    %116 = vector.load %arg3[%c13_100, %c0_101, %c0_102] : memref<16x16x32xbf16, #tpu.memory_space<vmem>>, vector<1x16x32xbf16>
    %117 = vector.shape_cast %116 : vector<1x16x32xbf16> to vector<16x32xbf16>
    %cst_103 = arith.constant dense<0.000000e+00> : vector<32x32xf32>
    %118 = tpu.matmul %115, %117, %cst_103 {dimension_numbers = #tpu.dot_dimension_numbers<[1], [0], [0], [1], [0, 0, 1, 1], [], []>} : vector<32x16xbf16>, vector<16x32xbf16>, vector<32x32xf32> -> vector<32x32xf32>
    %119 = arith.addf %111, %118 : vector<32x32xf32>
    %c14 = arith.constant 14 : index
    %c0_104 = arith.constant 0 : index
    %c0_105 = arith.constant 0 : index
    %120 = vector.load %arg2[%c14, %c0_104, %c0_105] : memref<16x32x128xbf16, #tpu.memory_space<vmem>>, vector<1x32x128xbf16>
    %121 = vector.shape_cast %120 : vector<1x32x128xbf16> to vector<32x128xbf16>
    %cst_106 = arith.constant dense<0.000000e+00> : vector<32x16xf32>
    %122 = tpu.matmul %121, %8, %cst_106 {dimension_numbers = #tpu.dot_dimension_numbers<[1], [0], [0], [1], [0, 0, 1, 1], [], []>} : vector<32x128xbf16>, vector<128x16xbf16>, vector<32x16xf32> -> vector<32x16xf32>
    %123 = arith.truncf %122 : vector<32x16xf32> to vector<32x16xbf16>
    %c14_107 = arith.constant 14 : index
    %c0_108 = arith.constant 0 : index
    %c0_109 = arith.constant 0 : index
    %124 = vector.load %arg3[%c14_107, %c0_108, %c0_109] : memref<16x16x32xbf16, #tpu.memory_space<vmem>>, vector<1x16x32xbf16>
    %125 = vector.shape_cast %124 : vector<1x16x32xbf16> to vector<16x32xbf16>
    %cst_110 = arith.constant dense<0.000000e+00> : vector<32x32xf32>
    %126 = tpu.matmul %123, %125, %cst_110 {dimension_numbers = #tpu.dot_dimension_numbers<[1], [0], [0], [1], [0, 0, 1, 1], [], []>} : vector<32x16xbf16>, vector<16x32xbf16>, vector<32x32xf32> -> vector<32x32xf32>
    %127 = arith.addf %119, %126 : vector<32x32xf32>
    %c15 = arith.constant 15 : index
    %c0_111 = arith.constant 0 : index
    %c0_112 = arith.constant 0 : index
    %128 = vector.load %arg2[%c15, %c0_111, %c0_112] : memref<16x32x128xbf16, #tpu.memory_space<vmem>>, vector<1x32x128xbf16>
    %129 = vector.shape_cast %128 : vector<1x32x128xbf16> to vector<32x128xbf16>
    %cst_113 = arith.constant dense<0.000000e+00> : vector<32x16xf32>
    %130 = tpu.matmul %129, %8, %cst_113 {dimension_numbers = #tpu.dot_dimension_numbers<[1], [0], [0], [1], [0, 0, 1, 1], [], []>} : vector<32x128xbf16>, vector<128x16xbf16>, vector<32x16xf32> -> vector<32x16xf32>
    %131 = arith.truncf %130 : vector<32x16xf32> to vector<32x16xbf16>
    %c15_114 = arith.constant 15 : index
    %c0_115 = arith.constant 0 : index
    %c0_116 = arith.constant 0 : index
    %132 = vector.load %arg3[%c15_114, %c0_115, %c0_116] : memref<16x16x32xbf16, #tpu.memory_space<vmem>>, vector<1x16x32xbf16>
    %133 = vector.shape_cast %132 : vector<1x16x32xbf16> to vector<16x32xbf16>
    %cst_117 = arith.constant dense<0.000000e+00> : vector<32x32xf32>
    %134 = tpu.matmul %131, %133, %cst_117 {dimension_numbers = #tpu.dot_dimension_numbers<[1], [0], [0], [1], [0, 0, 1, 1], [], []>} : vector<32x16xbf16>, vector<16x32xbf16>, vector<32x32xf32> -> vector<32x32xf32>
    %135 = arith.addf %127, %134 : vector<32x32xf32>
    %cst_118 = arith.constant 0.000000e+00 : f32
    %136 = vector.broadcast %cst_118 : f32 to vector<32x32xf32>
    %137 = arith.cmpf oge, %135, %136 : vector<32x32xf32>
    %cst_119 = arith.constant 2.000000e-01 : f32
    %138 = vector.broadcast %cst_119 : f32 to vector<32x32xf32>
    %139 = arith.mulf %138, %135 : vector<32x32xf32>
    %140 = arith.select %137, %135, %139 : vector<32x32xi1>, vector<32x32xf32>
    %c0_120 = arith.constant 0 : index
    %c0_121 = arith.constant 0 : index
    %141 = vector.load %arg4[%c0_120, %c0_121] : memref<32x32xf32, #tpu.memory_space<vmem>>, vector<32x32xf32>
    %142 = arith.mulf %140, %141 : vector<32x32xf32>
    %c0_122 = arith.constant 0 : index
    %c0_123 = arith.constant 0 : index
    %143 = vector.load %arg5[%c0_122, %c0_123] : memref<2x32xf32, #tpu.memory_space<vmem>>, vector<2x32xf32>
    %cst_124 = arith.constant dense<0.000000e+00> : vector<2x32xf32>
    %144 = tpu.matmul %143, %142, %cst_124 {dimension_numbers = #tpu.dot_dimension_numbers<[1], [0], [0], [1], [0, 0, 1, 1], [], []>} : vector<2x32xf32>, vector<32x32xf32>, vector<2x32xf32> -> vector<2x32xf32>
    %cst_125 = arith.constant dense<0.000000e+00> : vector<2xf32>
    %145 = vector.multi_reduction <add>, %144, %cst_125 [1] : vector<2x32xf32> to vector<2xf32>
    %146 = vector.shape_cast %145 : vector<2xf32> to vector<2x1xf32>
    %c0_126 = arith.constant 0 : index
    %c0_127 = arith.constant 0 : index
    %147 = vector.load %arg6[%c0_126, %c0_127] : memref<2x1xf32, #tpu.memory_space<vmem>>, vector<2x1xf32>
    tpu.vector_store %arg6[%c0_126, %c0_127], %146 {strides = array<i32>} : memref<2x1xf32, #tpu.memory_space<vmem>>, vector<2x1xf32>,
    return
  }
}

</mosaic_0001>

<bundles_post_ra>
// kernel: giraffe_discriminator_forward.1
= control target key start
LH: loop header
LB: loop body
LE: loop exit
PB: predicated region body
PF: predicated region fallthrough
CT: control target
= control target key end

     0   :  { %vm104_vm0 = vcmask 392192   ;;  %s4118_s1 = inlined_call_operand.vmem [shape: bf16[48,16], index: 1, kind: input, shape index: {}]   ;;  %s4119_s0 = inlined_call_operand.vmem [shape: bf16[128,48], index: 0, kind: input, shape index: {}]   ;;  %s4120_s2 = inlined_call_operand.vmem [shape: bf16[16,32,128], index: 2, kind: input, shape index: {}]   ;;  %s4121_s3 = inlined_call_operand.vmem [shape: bf16[16,16,32], index: 3, kind: input, shape index: {}]   ;;  %s4122_s4 = inlined_call_operand.vmem [shape: f32[32,32], index: 4, kind: input, shape index: {}]   ;;  %s4123_s5 = inlined_call_operand.vmem [shape: f32[2,32], index: 5, kind: input, shape index: {}]   ;;  %s4124_s6 = inlined_call_operand.vmem [shape: f32[2,1], index: 6, kind: output, shape index: {}]  }
   0x1   :  { %v3486_v0 = vld [vmem:[%s4118_s1] sm:$0xff]   ;;  %v3487_v1 = vld [vmem:[%s4118_s1 + $0x8] sm:$0xff]   ;;  %v3488_v3 = vld [vmem:[%s4118_s1 + $0x10] sm:$0xff]  }
   0x2   :  { %2968 = vmatprep.subr.bf16.mxu0 %v3486_v0  ;;  %v3489_v2 = vld [vmem:[%s4119_s0] sm:$0xff]   ;;  %v3490_v4 = vld [vmem:[%s4119_s0 + $0x8] sm:$0xff]   ;;  %v3491_v5 = vld [vmem:[%s4119_s0 + $0x10] sm:$0xff]  }
   0x3   :  { %2969 = vmatpush3.bf16.msra.mxu0 %v3486_v0  ;;  %2974 = vmatprep.mubr.msk.bf16.mxu0 %vm104_vm0, %v3489_v2  ;;  %v3492_v6 = vld [vmem:[%s4119_s0 + $0x18] sm:$0xff]   ;;  %v3493_v7 = vld [vmem:[%s4119_s0 + $0x20] sm:$0xff]   ;;  %v3494_v8 = vld [vmem:[%s4119_s0 + $0x28] sm:$0xff]  }
   0x4   :  { %2970 = vmatprep.subr.bf16.mxu0 %v3487_v1  ;;  %v3495_v9 = vld [vmem:[%s4119_s0 + $0x30] sm:$0xff]   ;;  %v3496_v10 = vld [vmem:[%s4119_s0 + $0x38] sm:$0xff]   ;;  %v3499_v12 = vld [vmem:[%s4120_s2] sm:$0xff]  }
   0x5   :  { %v3497_v11 = vld [vmem:[%s4120_s2 + $0x10] sm:$0xff]   ;;  %3006 = vmatprep.mubr.bf16.mxu1 %v3499_v12  ;;  %v3513_v12 = vld [vmem:[%s4121_s3 + $0x8] sm:$0xff]  }
   0x7   :  { %2971 = vmatpush3.bf16.msra.mxu0 %v3487_v1 }
   0x8   :  { %2972 = vmatprep.subr.bf16.mxu0 %v3488_v3 }
   0xb   :  { %2973 = vmatpush3.bf16.msra.mxu0 %v3488_v3 }
   0xe   :  { %2975 = vmatmul.mubr.msk.bf16.vlgmr.msra.gmra.mrb[0].mxu0 %vm104_vm0, %v3490_v4 }
   0xf   :  { %2978 = vmatprep.mubr.msk.bf16.mxu0 %vm104_vm0, %v3491_v5  ;;  %v3498_v5 = vld [vmem:[%s4120_s2 + $0x18] sm:$0xff]  }
  0x16   :  { %2979 = vmatmul.mubr.msk.bf16.gmra.mrb[4].mxu0 %vm104_vm0, %v3492_v6  ;;  %v3500_v6 = vld [vmem:[%s4120_s2 + $0x8] sm:$0xff]  }
  0x17   :  { %2982 = vmatprep.mubr.msk.bf16.mxu0 %vm104_vm0, %v3493_v7  ;;  %v3501_v7 = vld [vmem:[%s4120_s2 + $0x20] sm:$0xff]  }
  0x1e   :  { %2983 = vmatmul.mubr.msk.bf16.gmra.mrb[8].mxu0 %vm104_vm0, %v3494_v8  ;;  %v3502_v8 = vld [vmem:[%s4120_s2 + $0x28] sm:$0xff]  }
  0x1f   :  { %2986 = vmatprep.mubr.msk.bf16.mxu0 %vm104_vm0, %v3495_v9  ;;  %v3503_v9 = vld [vmem:[%s4120_s2 + $0x40] sm:$0xff]  }
  0x26   :  { %2987 = vmatmul.mubr.msk.bf16.gmra.mrb[12].mxu0 %vm104_vm0, %v3496_v10  ;;  %v3504_v10 = vld [vmem:[%s4120_s2 + $0x48] sm:$0xff]  }
  0x27   :  { %3026 = vmatprep.mubr.bf16.mxu0 %v3497_v11  ;;  %v3505_v11 = vld [vmem:[%s4120_s2 + $0x60] sm:$0xff]  }
  0xe1   :  { %v2976_v13 = vpop.f32.mrb[0].mxu0 }
  0xe2   :  { %v244_v14 = vmul.f32 0.2, %v2976_v13  ;;  %v163_v15 = vpop.f32.mrb[1].mxu0  ;;  %vm228_vm1 = vcmp.ge.f32.partialorder %v2976_v13, 0.0 }
  0xe3   :  { %v242_v16 = vmul.f32 0.2, %v163_v15  ;;  %v2977_v17 = vpop.f32.mrb[2].mxu0  ;;  %vm226_vm2 = vcmp.ge.f32.partialorder %v163_v15, 0.0 }
  0xe4   :  { %vm229_vm3 = vcmp.ge.f32.partialorder %v2977_v17, 0.0  ;;  %v245_v18 = vmul.f32 0.2, %v2977_v17  ;;  %v166_v19 = vpop.f32.mrb[3].mxu0  ;;  %v260_v21 = vsel %vm228_vm1, %v2976_v13, %v244_v14  ;;  %v3506_v13 = vld [vmem:[%s4120_s2 + $0x68] sm:$0xff]   ;;  %v3507_v14 = vld [vmem:[%s4120_s2 + $0x70] sm:$0xff]  }
  0xe5   :  { %vm227_vm4 = vcmp.ge.f32.partialorder %v166_v19, 0.0  ;;  %v243_v20 = vmul.f32 0.2, %v166_v19  ;;  %v258_v23 = vsel %vm226_vm2, %v163_v15, %v242_v16  ;;  %v3760_v15 = vld [vmem:[%s4121_s3] sm:$0xff]   ;;  %v3508_v16 = vld [vmem:[%s4120_s2 + $0x78] sm:$0xff]   ;;  %vm428_vm1 = vcmask 130048  }
  0xe6   :  { %v261_v22 = vsel %vm229_vm3, %v2977_v17, %v245_v18  ;;  %v3509_v17 = vld [vmem:[%s4120_s2 + $0x90] sm:$0xff]   ;;  %v3510_v18 = vld [vmem:[%s4120_s2 + $0x98] sm:$0xff]   ;;  %vm3546_vm2 = vmmov 0  }
  0xe7   :  { %v3630_v24 = vpack.c.bf16 %v261_v22, %v260_v21  ;;  %v259_v25 = vsel %vm227_vm4, %v166_v19, %v243_v20  ;;  %v3511_v19 = vld [vmem:[%s4120_s2 + $0xa0] sm:$0xff]   ;;  %v3512_v20 = vld [vmem:[%s4120_s2 + $0xa8] sm:$0xff]  }
  0xe8   :  { %v3632_v26 = vpack.c.bf16 %v259_v25, %v258_v23  ;;  %v3514_v21 = vld [vmem:[%s4120_s2 + $0xc0] sm:$0xff]  }
  0xe9   :  { %v2980_v27 = vpop.f32.mrb[4].mxu0 }
  0xea   :  { %v248_v28 = vmul.f32 0.2, %v2980_v27  ;;  %v179_v29 = vpop.f32.mrb[5].mxu0  ;;  %2990 = vmatprep.subr.bf16.mxu1 %v3632_v26  ;;  %3010 = vmatprep.subr.bf16.mxu0 %v3632_v26  ;;  %vm232_vm5 = vcmp.ge.f32.partialorder %v2980_v27, 0.0 }
  0xeb   :  { %v246_v30 = vmul.f32 0.2, %v179_v29  ;;  %v2981_v31 = vpop.f32.mrb[6].mxu0  ;;  %2991 = vmatpush3.bf16.msra.mxu1 %v3632_v26  ;;  %3011 = vmatpush3.bf16.msra.mxu0 %v3632_v26  ;;  %vm230_vm6 = vcmp.ge.f32.partialorder %v179_v29, 0.0 }
  0xec   :  { %vm233_vm7 = vcmp.ge.f32.partialorder %v2981_v31, 0.0  ;;  %v249_v32 = vmul.f32 0.2, %v2981_v31  ;;  %v182_v33 = vpop.f32.mrb[7].mxu0  ;;  %2992 = vmatprep.subr.bf16.mxu1 %v3630_v24  ;;  %3012 = vmatprep.subr.bf16.mxu0 %v3630_v24  ;;  %v264_v35 = vsel %vm232_vm5, %v2980_v27, %v248_v28 }
  0xed   :  { %vm231_vm8 = vcmp.ge.f32.partialorder %v182_v33, 0.0  ;;  %v247_v34 = vmul.f32 0.2, %v182_v33  ;;  %v262_v37 = vsel %vm230_vm6, %v179_v29, %v246_v30 }
  0xee   :  { %v265_v36 = vsel %vm233_vm7, %v2981_v31, %v249_v32  ;;  %vm2470_vm7 = vcmask 261120  }
  0xef   :  { %v3640_v38 = vpack.c.bf16 %v265_v36, %v264_v35  ;;  %v263_v39 = vsel %vm231_vm8, %v182_v33, %v247_v34  ;;  %2993 = vmatpush3.bf16.msra.mxu1 %v3630_v24  ;;  %3013 = vmatpush3.bf16.msra.mxu0 %v3630_v24  ;;  %v3517_v36 = vld [vmem:[%s4121_s3 + $0x10] sm:$0xff]   ;;  %vm2544_vm8 = vcmask 254976  }
  0xf0   :  { %v3644_v40 = vpack.c.bf16 %v263_v39, %v262_v37  ;;  %v3516_v37 = vld [vmem:[%s4120_s2 + $0xc8] sm:$0xff]   ;;  %v3518_v39 = vld [vmem:[%s4120_s2 + $0xe0] sm:$0xff]  }
  0xf1   :  { %v2984_v41 = vpop.f32.mrb[8].mxu0 }
  0xf2   :  { %v252_v42 = vmul.f32 0.2, %v2984_v41  ;;  %v195_v43 = vpop.f32.mrb[9].mxu0  ;;  %2994 = vmatprep.subr.bf16.mxu1 %v3644_v40  ;;  %3014 = vmatprep.subr.bf16.mxu0 %v3644_v40  ;;  %vm236_vm9 = vcmp.ge.f32.partialorder %v2984_v41, 0.0 }
  0xf3   :  { %v250_v44 = vmul.f32 0.2, %v195_v43  ;;  %v2985_v45 = vpop.f32.mrb[10].mxu0  ;;  %2995 = vmatpush3.bf16.msra.mxu1 %v3644_v40  ;;  %3015 = vmatpush3.bf16.msra.mxu0 %v3644_v40  ;;  %vm234_vm10 = vcmp.ge.f32.partialorder %v195_v43, 0.0 }
  0xf4   :  { %vm237_vm11 = vcmp.ge.f32.partialorder %v2985_v45, 0.0  ;;  %v253_v46 = vmul.f32 0.2, %v2985_v45  ;;  %v198_v47 = vpop.f32.mrb[11].mxu0  ;;  %2996 = vmatprep.subr.bf16.mxu1 %v3640_v38  ;;  %3016 = vmatprep.subr.bf16.mxu0 %v3640_v38  ;;  %v268_v49 = vsel %vm236_vm9, %v2984_v41, %v252_v42  ;;  %vm2548_vm9 = vcmask 1024  }
  0xf5   :  { %vm235_vm12 = vcmp.ge.f32.partialorder %v198_v47, 0.0  ;;  %v251_v48 = vmul.f32 0.2, %v198_v47  ;;  %v266_v51 = vsel %vm234_vm10, %v195_v43, %v250_v44 }
  0xf6   :  { %v269_v50 = vsel %vm237_vm11, %v2985_v45, %v253_v46 }
  0xf7   :  { %v3652_v52 = vpack.c.bf16 %v269_v50, %v268_v49  ;;  %v267_v53 = vsel %vm235_vm12, %v198_v47, %v251_v48  ;;  %2997 = vmatpush3.bf16.msra.mxu1 %v3640_v38  ;;  %3017 = vmatpush3.bf16.msra.mxu0 %v3640_v38  ;;  %v3520_v47 = vld [vmem:[%s4120_s2 + $0x30] sm:$0xff]   ;;  %v3519_v48 = vld [vmem:[%s4120_s2 + $0xe8] sm:$0xff]   ;;  %v3522_v49 = vld [vmem:[%s4121_s3 + $0x18] sm:$0xff]  }
  0xf8   :  { %v3656_v54 = vpack.c.bf16 %v267_v53, %v266_v51  ;;  %v3521_v50 = vld [vmem:[%s4120_s2 + $0x38] sm:$0xff]   ;;  %v3523_v51 = vld [vmem:[%s4121_s3 + $0x20] sm:$0xff]  }
  0xf9   :  { %v2988_v55 = vpop.f32.mrb[12].mxu0 }
  0xfa   :  { %v256_v56 = vmul.f32 0.2, %v2988_v55  ;;  %v211_v57 = vpop.f32.mrb[13].mxu0  ;;  %2998 = vmatprep.subr.bf16.mxu1 %v3656_v54  ;;  %3018 = vmatprep.subr.bf16.mxu0 %v3656_v54  ;;  %vm240_vm13 = vcmp.ge.f32.partialorder %v2988_v55, 0.0 }
  0xfb   :  { %v254_v58 = vmul.f32 0.2, %v211_v57  ;;  %v2989_v59 = vpop.f32.mrb[14].mxu0  ;;  %2999 = vmatpush3.bf16.msra.mxu1 %v3656_v54  ;;  %3019 = vmatpush3.bf16.msra.mxu0 %v3656_v54  ;;  %vm238_vm14 = vcmp.ge.f32.partialorder %v211_v57, 0.0 }
  0xfc   :  { %vm241_vm15 = vcmp.ge.f32.partialorder %v2989_v59, 0.0  ;;  %v257_v60 = vmul.f32 0.2, %v2989_v59  ;;  %v214_v61 = vpop.f32.mrb[15].mxu0  ;;  %3000 = vmatprep.subr.bf16.mxu1 %v3652_v52  ;;  %3020 = vmatprep.subr.bf16.mxu0 %v3652_v52  ;;  %v272_v63 = vsel %vm240_vm13, %v2988_v55, %v256_v56 }
  0xfd   :  { %vm239_vm0 = vcmp.ge.f32.partialorder %v214_v61, 0.0  ;;  %v255_v62 = vmul.f32 0.2, %v214_v61  ;;  %v270_v1 = vsel %vm238_vm14, %v211_v57, %v254_v58 }
  0xfe   :  { %v273_v0 = vsel %vm241_vm15, %v2989_v59, %v257_v60 }
  0xff   :  { %v3664_v2 = vpack.c.bf16 %v273_v0, %v272_v63  ;;  %v271_v3 = vsel %vm239_vm0, %v214_v61, %v255_v62  ;;  %3001 = vmatpush3.bf16.msra.mxu1 %v3652_v52  ;;  %3021 = vmatpush3.bf16.msra.mxu0 %v3652_v52 }
 0x100   :  { %v3668_v4 = vpack.c.bf16 %v271_v3, %v270_v1 }
 0x102   :  { %3002 = vmatprep.subr.bf16.mxu1 %v3668_v4  ;;  %3022 = vmatprep.subr.bf16.mxu0 %v3668_v4 }
 0x103   :  { %3003 = vmatpush3.bf16.msra.mxu1 %v3668_v4  ;;  %3023 = vmatpush3.bf16.msra.mxu0 %v3668_v4 }
 0x104   :  { %3004 = vmatprep.subr.bf16.mxu1 %v3664_v2  ;;  %3024 = vmatprep.subr.bf16.mxu0 %v3664_v2 }
 0x107   :  { %3005 = vmatpush3.bf16.msra.mxu1 %v3664_v2  ;;  %3025 = vmatpush3.bf16.msra.mxu0 %v3664_v2 }
 0x108   :  { %3042 = vmatprep.subr.bf16.mxu0 %v3632_v26  ;;  %3030 = vmatprep.subr.bf16.mxu1 %v3513_v12 }
 0x10a   :  { %3027 = vmatmul.mubr.bf16.vlgmr.msra.gmra.mrb[16].mxu0 %v3498_v5  ;;  %3007 = vmatmul.mubr.bf16.vlgmr.msra.gmra.mrb[0].mxu1 %v3500_v6 }
 0x10b   :  { %3043 = vmatpush3.bf16.msra.mxu0 %v3632_v26  ;;  %3058 = vmatprep.mubr.bf16.mxu0 %v3501_v7 }
 0x10c   :  { %3044 = vmatprep.subr.bf16.mxu0 %v3630_v24  ;;  %3031 = vmatpush3.bf16.msra.mxu1 %v3513_v12  ;;  %v3525_v12 = vld [vmem:[%s4120_s2 + $0x58] sm:$0xff]  }
 0x10d   :  { %3036 = vmatprep.subr.bf16.mxu1 %v3760_v15 }
 0x10f   :  { %3045 = vmatpush3.bf16.msra.mxu0 %v3630_v24 }
 0x110   :  { %3046 = vmatprep.subr.bf16.mxu0 %v3644_v40 }
 0x113   :  { %3047 = vmatpush3.bf16.msra.mxu0 %v3644_v40 }
 0x114   :  { %3048 = vmatprep.subr.bf16.mxu0 %v3640_v38 }
 0x117   :  { %3049 = vmatpush3.bf16.msra.mxu0 %v3640_v38 }
 0x118   :  { %3050 = vmatprep.subr.bf16.mxu0 %v3656_v54 }
 0x11b   :  { %3051 = vmatpush3.bf16.msra.mxu0 %v3656_v54 }
 0x11c   :  { %3052 = vmatprep.subr.bf16.mxu0 %v3652_v52 }
 0x11f   :  { %3053 = vmatpush3.bf16.msra.mxu0 %v3652_v52 }
 0x120   :  { %3054 = vmatprep.subr.bf16.mxu0 %v3668_v4 }
 0x123   :  { %3055 = vmatpush3.bf16.msra.mxu0 %v3668_v4 }
 0x124   :  { %3056 = vmatprep.subr.bf16.mxu0 %v3664_v2 }
 0x127   :  { %3057 = vmatpush3.bf16.msra.mxu0 %v3664_v2 }
 0x128   :  { %3094 = vmatprep.subr.bf16.mxu0 %v3632_v26 }
 0x12a   :  { %3059 = vmatmul.mubr.bf16.vlgmr.msra.gmra.mrb[20].mxu0 %v3502_v8 }
 0x12b   :  { %3095 = vmatpush3.bf16.msra.mxu0 %v3632_v26  ;;  %3110 = vmatprep.mubr.bf16.mxu0 %v3503_v9 }
 0x12c   :  { %3096 = vmatprep.subr.bf16.mxu0 %v3630_v24 }
 0x12f   :  { %3097 = vmatpush3.bf16.msra.mxu0 %v3630_v24 }
 0x130   :  { %3098 = vmatprep.subr.bf16.mxu0 %v3644_v40 }
 0x133   :  { %3099 = vmatpush3.bf16.msra.mxu0 %v3644_v40 }
 0x134   :  { %3100 = vmatprep.subr.bf16.mxu0 %v3640_v38 }
 0x137   :  { %3101 = vmatpush3.bf16.msra.mxu0 %v3640_v38 }
 0x138   :  { %3102 = vmatprep.subr.bf16.mxu0 %v3656_v54 }
 0x13b   :  { %3103 = vmatpush3.bf16.msra.mxu0 %v3656_v54 }
 0x13c   :  { %3104 = vmatprep.subr.bf16.mxu0 %v3652_v52 }
 0x13f   :  { %3105 = vmatpush3.bf16.msra.mxu0 %v3652_v52 }
 0x140   :  { %3106 = vmatprep.subr.bf16.mxu0 %v3668_v4 }
 0x143   :  { %3107 = vmatpush3.bf16.msra.mxu0 %v3668_v4 }
 0x144   :  { %3108 = vmatprep.subr.bf16.mxu0 %v3664_v2 }
 0x147   :  { %3109 = vmatpush3.bf16.msra.mxu0 %v3664_v2 }
 0x148   :  { %3146 = vmatprep.subr.bf16.mxu0 %v3632_v26 }
 0x14a   :  { %3111 = vmatmul.mubr.bf16.vlgmr.msra.gmra.mrb[24].mxu0 %v3504_v10  ;;  %v3524_v10 = vld [vmem:[%s4120_s2 + $0x50] sm:$0xff]  }
 0x14b   :  { %3147 = vmatpush3.bf16.msra.mxu0 %v3632_v26  ;;  %3162 = vmatprep.mubr.bf16.mxu0 %v3505_v11  ;;  %v3526_v11 = vld [vmem:[%s4121_s3 + $0x28] sm:$0xff]  }
 0x14c   :  { %3148 = vmatprep.subr.bf16.mxu0 %v3630_v24 }
 0x14f   :  { %3149 = vmatpush3.bf16.msra.mxu0 %v3630_v24 }
 0x150   :  { %3150 = vmatprep.subr.bf16.mxu0 %v3644_v40 }
 0x153   :  { %3151 = vmatpush3.bf16.msra.mxu0 %v3644_v40 }
 0x154   :  { %3152 = vmatprep.subr.bf16.mxu0 %v3640_v38 }
 0x157   :  { %3153 = vmatpush3.bf16.msra.mxu0 %v3640_v38 }
 0x158   :  { %3154 = vmatprep.subr.bf16.mxu0 %v3656_v54 }
 0x15b   :  { %3155 = vmatpush3.bf16.msra.mxu0 %v3656_v54 }
 0x15c   :  { %3156 = vmatprep.subr.bf16.mxu0 %v3652_v52 }
 0x15f   :  { %3157 = vmatpush3.bf16.msra.mxu0 %v3652_v52 }
 0x160   :  { %3158 = vmatprep.subr.bf16.mxu0 %v3668_v4 }
 0x163   :  { %3159 = vmatpush3.bf16.msra.mxu0 %v3668_v4 }
 0x164   :  { %3160 = vmatprep.subr.bf16.mxu0 %v3664_v2 }
 0x167   :  { %3161 = vmatpush3.bf16.msra.mxu0 %v3664_v2 }
 0x168   :  { %3172 = vmatprep.subr.bf16.mxu0 %v3632_v26 }
 0x16a   :  { %3163 = vmatmul.mubr.bf16.vlgmr.msra.gmra.mrb[28].mxu0 %v3506_v13  ;;  %v3527_v13 = vld [vmem:[%s4121_s3 + $0x30] sm:$0xff]  }
 0x16b   :  { %3173 = vmatpush3.bf16.msra.mxu0 %v3632_v26  ;;  %3188 = vmatprep.mubr.bf16.mxu0 %v3507_v14 }
 0x16c   :  { %3174 = vmatprep.subr.bf16.mxu0 %v3630_v24 }
 0x16f   :  { %3175 = vmatpush3.bf16.msra.mxu0 %v3630_v24 }
 0x170   :  { %3176 = vmatprep.subr.bf16.mxu0 %v3644_v40 }
 0x173   :  { %3177 = vmatpush3.bf16.msra.mxu0 %v3644_v40 }
 0x174   :  { %3178 = vmatprep.subr.bf16.mxu0 %v3640_v38 }
 0x177   :  { %3179 = vmatpush3.bf16.msra.mxu0 %v3640_v38 }
 0x178   :  { %3180 = vmatprep.subr.bf16.mxu0 %v3656_v54 }
 0x17b   :  { %3181 = vmatpush3.bf16.msra.mxu0 %v3656_v54 }
 0x17c   :  { %3182 = vmatprep.subr.bf16.mxu0 %v3652_v52 }
 0x17f   :  { %3183 = vmatpush3.bf16.msra.mxu0 %v3652_v52 }
 0x180   :  { %3184 = vmatprep.subr.bf16.mxu0 %v3668_v4 }
 0x183   :  { %3185 = vmatpush3.bf16.msra.mxu0 %v3668_v4 }
 0x184   :  { %3186 = vmatprep.subr.bf16.mxu0 %v3664_v2 }
 0x187   :  { %3187 = vmatpush3.bf16.msra.mxu0 %v3664_v2 }
 0x188   :  { %3224 = vmatprep.subr.bf16.mxu0 %v3632_v26 }
 0x18a   :  { %3189 = vmatmul.mubr.bf16.vlgmr.msra.gmra.mrb[32].mxu0 %v3508_v16 }
 0x18b   :  { %3225 = vmatpush3.bf16.msra.mxu0 %v3632_v26  ;;  %3240 = vmatprep.mubr.bf16.mxu0 %v3509_v17 }
 0x18c   :  { %3226 = vmatprep.subr.bf16.mxu0 %v3630_v24 }
 0x18f   :  { %3227 = vmatpush3.bf16.msra.mxu0 %v3630_v24 }
 0x190   :  { %3228 = vmatprep.subr.bf16.mxu0 %v3644_v40 }
 0x193   :  { %3229 = vmatpush3.bf16.msra.mxu0 %v3644_v40 }
 0x194   :  { %3230 = vmatprep.subr.bf16.mxu0 %v3640_v38 }
 0x197   :  { %3231 = vmatpush3.bf16.msra.mxu0 %v3640_v38 }
 0x198   :  { %3232 = vmatprep.subr.bf16.mxu0 %v3656_v54 }
 0x19b   :  { %3233 = vmatpush3.bf16.msra.mxu0 %v3656_v54 }
 0x19c   :  { %3234 = vmatprep.subr.bf16.mxu0 %v3652_v52 }
 0x19f   :  { %3235 = vmatpush3.bf16.msra.mxu0 %v3652_v52 }
 0x1a0   :  { %3236 = vmatprep.subr.bf16.mxu0 %v3668_v4 }
 0x1a3   :  { %3237 = vmatpush3.bf16.msra.mxu0 %v3668_v4 }
 0x1a4   :  { %3238 = vmatprep.subr.bf16.mxu0 %v3664_v2 }
 0x1a7   :  { %3239 = vmatpush3.bf16.msra.mxu0 %v3664_v2 }
 0x1a8   :  { %3250 = vmatprep.subr.bf16.mxu0 %v3632_v26 }
 0x1aa   :  { %3241 = vmatmul.mubr.bf16.vlgmr.msra.gmra.mrb[36].mxu0 %v3510_v18 }
 0x1ab   :  { %3251 = vmatpush3.bf16.msra.mxu0 %v3632_v26  ;;  %3266 = vmatprep.mubr.bf16.mxu0 %v3511_v19 }
 0x1ac   :  { %3252 = vmatprep.subr.bf16.mxu0 %v3630_v24 }
 0x1af   :  { %3253 = vmatpush3.bf16.msra.mxu0 %v3630_v24 }
 0x1b0   :  { %3254 = vmatprep.subr.bf16.mxu0 %v3644_v40 }
 0x1b3   :  { %3255 = vmatpush3.bf16.msra.mxu0 %v3644_v40 }
 0x1b4   :  { %3256 = vmatprep.subr.bf16.mxu0 %v3640_v38 }
 0x1b7   :  { %3257 = vmatpush3.bf16.msra.mxu0 %v3640_v38 }
 0x1b8   :  { %3258 = vmatprep.subr.bf16.mxu0 %v3656_v54 }
 0x1bb   :  { %3259 = vmatpush3.bf16.msra.mxu0 %v3656_v54 }
 0x1bc   :  { %3260 = vmatprep.subr.bf16.mxu0 %v3652_v52 }
 0x1bf   :  { %3261 = vmatpush3.bf16.msra.mxu0 %v3652_v52 }
 0x1c0   :  { %3262 = vmatprep.subr.bf16.mxu0 %v3668_v4 }
 0x1c3   :  { %3263 = vmatpush3.bf16.msra.mxu0 %v3668_v4 }
 0x1c4   :  { %3264 = vmatprep.subr.bf16.mxu0 %v3664_v2 }
 0x1c7   :  { %3265 = vmatpush3.bf16.msra.mxu0 %v3664_v2 }
 0x1c8   :  { %3302 = vmatprep.subr.bf16.mxu0 %v3632_v26 }
 0x1ca   :  { %3267 = vmatmul.mubr.bf16.vlgmr.msra.gmra.mrb[40].mxu0 %v3512_v20 }
 0x1cb   :  { %3303 = vmatpush3.bf16.msra.mxu0 %v3632_v26  ;;  %3318 = vmatprep.mubr.bf16.mxu0 %v3514_v21 }
 0x1cc   :  { %3304 = vmatprep.subr.bf16.mxu0 %v3630_v24 }
 0x1cf   :  { %3305 = vmatpush3.bf16.msra.mxu0 %v3630_v24 }
 0x1d0   :  { %3306 = vmatprep.subr.bf16.mxu0 %v3644_v40 }
 0x1d3   :  { %3307 = vmatpush3.bf16.msra.mxu0 %v3644_v40 }
 0x1d4   :  { %3308 = vmatprep.subr.bf16.mxu0 %v3640_v38 }
 0x1d7   :  { %3309 = vmatpush3.bf16.msra.mxu0 %v3640_v38 }
 0x1d8   :  { %3310 = vmatprep.subr.bf16.mxu0 %v3656_v54 }
 0x1db   :  { %3311 = vmatpush3.bf16.msra.mxu0 %v3656_v54 }
 0x1dc   :  { %3312 = vmatprep.subr.bf16.mxu0 %v3652_v52 }
 0x1dd   :  { %v3028_v22 = vpop.f32.mrb[16].mxu0  ;;  %v3008_v23 = vpop.f32.mrb[0].mxu1 }
 0x1de   :  { %v402_v25 = vpop.f32.mrb[17].mxu0  ;;  %v332_v27 = vpop.f32.mrb[1].mxu1 }
 0x1df   :  { %v3029_v28 = vpop.f32.mrb[18].mxu0  ;;  %3313 = vmatpush3.bf16.msra.mxu0 %v3652_v52  ;;  %v3009_v29 = vpop.f32.mrb[2].mxu1 }
 0x1e0   :  { %v418_v30 = vpack.c.bf16 %v3029_v28, %v3028_v22  ;;  %v405_v31 = vpop.f32.mrb[19].mxu0  ;;  %3314 = vmatprep.subr.bf16.mxu0 %v3668_v4  ;;  %v348_v32 = vpack.c.bf16 %v3009_v29, %v3008_v23  ;;  %v335_v33 = vpop.f32.mrb[3].mxu1 }
 0x1e1   :  { %v417_v34 = vpack.c.bf16 %v405_v31, %v402_v25  ;;  %v347_v35 = vpack.c.bf16 %v335_v33, %v332_v27 }
 0x1e3   :  { %3032 = vmatprep.mubr.msk.bf16.mxu1 %vm428_vm1, %v417_v34  ;;  %3315 = vmatpush3.bf16.msra.mxu0 %v3668_v4  ;;  %v3528_v34 = vld [vmem:[%s4121_s3 + $0x38] sm:$0xff]  }
 0x1e4   :  { %3033 = vmatmul.mubr.msk.bf16.vlgmr.msra.gmra.mrb[4].mxu1 %vm428_vm1, %v418_v30  ;;  %3316 = vmatprep.subr.bf16.mxu0 %v3664_v2 }
 0x1e5   :  { %3037 = vmatpush3.bf16.msra.mxu1 %v3760_v15  ;;  %3038 = vmatprep.mubr.msk.bf16.mxu1 %vm428_vm1, %v347_v35  ;;  %v3529_v35 = vld [vmem:[%s4120_s2 + $0x80] sm:$0xff]  }
 0x1e6   :  { %3062 = vmatprep.subr.bf16.mxu1 %v3517_v36 }
 0x1e7   :  { %3317 = vmatpush3.bf16.msra.mxu0 %v3664_v2 }
 0x1e8   :  { %3354 = vmatprep.subr.bf16.mxu0 %v3632_v26 }
 0x1ea   :  { %3319 = vmatmul.mubr.bf16.vlgmr.msra.gmra.mrb[44].mxu0 %v3516_v37  ;;  %v3530_v37 = vld [vmem:[%s4120_s2 + $0x88] sm:$0xff]  }
 0x1eb   :  { %3355 = vmatpush3.bf16.msra.mxu0 %v3632_v26  ;;  %3370 = vmatprep.mubr.bf16.mxu0 %v3518_v39  ;;  %v3532_v39 = vld [vmem:[%s4121_s3 + $0x48] sm:$0xff]  }
 0x1ec   :  { %3356 = vmatprep.subr.bf16.mxu0 %v3630_v24 }
 0x1ef   :  { %3357 = vmatpush3.bf16.msra.mxu0 %v3630_v24 }
 0x1f0   :  { %3039 = vmatmul.mubr.msk.bf16.vlgmr.msra.gmra.mrb[4].mxu1 %vm428_vm1, %v348_v32  ;;  %3358 = vmatprep.subr.bf16.mxu0 %v3644_v40 }
 0x1f1   :  { %3063 = vmatpush3.bf16.msra.mxu1 %v3517_v36  ;;  %v3531_v36 = vld [vmem:[%s4121_s3 + $0x40] sm:$0xff]  }
 0x1f2   :  { %3068 = vmatprep.subr.bf16.mxu1 %v3632_v26 }
 0x1f3   :  { %3359 = vmatpush3.bf16.msra.mxu0 %v3644_v40 }
 0x1f4   :  { %3360 = vmatprep.subr.bf16.mxu0 %v3640_v38 }
 0x1f7   :  { %3361 = vmatpush3.bf16.msra.mxu0 %v3640_v38 }
 0x1f8   :  { %3362 = vmatprep.subr.bf16.mxu0 %v3656_v54 }
 0x1fb   :  { %3363 = vmatpush3.bf16.msra.mxu0 %v3656_v54 }
 0x1fc   :  { %3364 = vmatprep.subr.bf16.mxu0 %v3652_v52 }
 0x1fd   :  { %v3060_v41 = vpop.f32.mrb[20].mxu0 }
 0x1fe   :  { %v596_v42 = vpop.f32.mrb[21].mxu0 }
 0x1ff   :  { %v3061_v43 = vpop.f32.mrb[22].mxu0  ;;  %3365 = vmatpush3.bf16.msra.mxu0 %v3652_v52 }
 0x200   :  { %v612_v44 = vpack.c.bf16 %v3061_v43, %v3060_v41  ;;  %v599_v45 = vpop.f32.mrb[23].mxu0  ;;  %3366 = vmatprep.subr.bf16.mxu0 %v3668_v4 }
 0x201   :  { %v611_v46 = vpack.c.bf16 %v599_v45, %v596_v42 }
 0x203   :  { %3064 = vmatprep.mubr.msk.bf16.mxu1 %vm428_vm1, %v611_v46  ;;  %3367 = vmatpush3.bf16.msra.mxu0 %v3668_v4 }
 0x204   :  { %3065 = vmatmul.mubr.msk.bf16.vlgmr.msra.gmra.mrb[4].mxu1 %vm428_vm1, %v612_v44  ;;  %3368 = vmatprep.subr.bf16.mxu0 %v3664_v2 }
 0x205   :  { %3069 = vmatpush3.bf16.msra.mxu1 %v3632_v26  ;;  %3084 = vmatprep.mubr.bf16.mxu1 %v3520_v47 }
 0x206   :  { %3070 = vmatprep.subr.bf16.mxu1 %v3630_v24 }
 0x207   :  { %3369 = vmatpush3.bf16.msra.mxu0 %v3664_v2 }
 0x208   :  { %3380 = vmatprep.subr.bf16.mxu0 %v3632_v26 }
 0x209   :  { %3071 = vmatpush3.bf16.msra.mxu1 %v3630_v24 }
 0x20a   :  { %3072 = vmatprep.subr.bf16.mxu1 %v3644_v40  ;;  %3371 = vmatmul.mubr.bf16.vlgmr.msra.gmra.mrb[48].mxu0 %v3519_v48 }
 0x20b   :  { %3381 = vmatpush3.bf16.msra.mxu0 %v3632_v26 }
 0x20c   :  { %3382 = vmatprep.subr.bf16.mxu0 %v3630_v24 }
 0x20d   :  { %3073 = vmatpush3.bf16.msra.mxu1 %v3644_v40 }
 0x20e   :  { %3074 = vmatprep.subr.bf16.mxu1 %v3640_v38 }
 0x20f   :  { %3383 = vmatpush3.bf16.msra.mxu0 %v3630_v24 }
 0x210   :  { %3384 = vmatprep.subr.bf16.mxu0 %v3644_v40 }
 0x211   :  { %3075 = vmatpush3.bf16.msra.mxu1 %v3640_v38 }
 0x212   :  { %3076 = vmatprep.subr.bf16.mxu1 %v3656_v54 }
 0x213   :  { %3385 = vmatpush3.bf16.msra.mxu0 %v3644_v40 }
 0x214   :  { %3386 = vmatprep.subr.bf16.mxu0 %v3640_v38 }
 0x215   :  { %3077 = vmatpush3.bf16.msra.mxu1 %v3656_v54 }
 0x216   :  { %3078 = vmatprep.subr.bf16.mxu1 %v3652_v52 }
 0x217   :  { %3387 = vmatpush3.bf16.msra.mxu0 %v3640_v38 }
 0x218   :  { %3388 = vmatprep.subr.bf16.mxu0 %v3656_v54 }
 0x219   :  { %3079 = vmatpush3.bf16.msra.mxu1 %v3652_v52 }
 0x21a   :  { %3080 = vmatprep.subr.bf16.mxu1 %v3668_v4 }
 0x21b   :  { %3389 = vmatpush3.bf16.msra.mxu0 %v3656_v54 }
 0x21c   :  { %3390 = vmatprep.subr.bf16.mxu0 %v3652_v52 }
 0x21d   :  { %3081 = vmatpush3.bf16.msra.mxu1 %v3668_v4  ;;  %v3112_v53 = vpop.f32.mrb[24].mxu0 }
 0x21e   :  { %3082 = vmatprep.subr.bf16.mxu1 %v3664_v2  ;;  %v868_v55 = vpop.f32.mrb[25].mxu0 }
 0x21f   :  { %3391 = vmatpush3.bf16.msra.mxu0 %v3652_v52  ;;  %v3113_v56 = vpop.f32.mrb[26].mxu0 }
 0x220   :  { %3392 = vmatprep.subr.bf16.mxu0 %v3668_v4  ;;  %v884_v57 = vpack.c.bf16 %v3113_v56, %v3112_v53  ;;  %v871_v58 = vpop.f32.mrb[27].mxu0  ;;  %v3534_v56 = vld [vmem:[%s4120_s2 + $0xb0] sm:$0xff]  }
 0x221   :  { %3083 = vmatpush3.bf16.msra.mxu1 %v3664_v2  ;;  %v883_v59 = vpack.c.bf16 %v871_v58, %v868_v55  ;;  %v3533_v55 = vld [vmem:[%s4121_s3 + $0x50] sm:$0xff]   ;;  %v3535_v58 = vld [vmem:[%s4120_s2 + $0xb8] sm:$0xff]  }
 0x222   :  { %3088 = vmatprep.subr.bf16.mxu1 %v3522_v49 }
 0x223   :  { %3393 = vmatpush3.bf16.msra.mxu0 %v3668_v4 }
 0x224   :  { %3085 = vmatmul.mubr.bf16.vlgmr.msra.gmra.mrb[8].mxu1 %v3521_v50  ;;  %3394 = vmatprep.subr.bf16.mxu0 %v3664_v2 }
 0x225   :  { %3089 = vmatpush3.bf16.msra.mxu1 %v3522_v49 }
 0x226   :  { %3114 = vmatprep.subr.bf16.mxu1 %v3523_v51 }
 0x227   :  { %3395 = vmatpush3.bf16.msra.mxu0 %v3664_v2 }
 0x23d   :  { %v3923_v60 = vpop.f32.mrb[28].mxu0 }
 0x23e   :  { %v3925_v61 = vpop.f32.mrb[29].mxu0 }
 0x23f   :  { %v3927_v62 = vpop.f32.mrb[30].mxu0 }
 0x240   :  { %v1156_v63 = vpack.c.bf16 %v3927_v62, %v3923_v60  ;;  %v1143_v0 = vpop.f32.mrb[31].mxu0 }
 0x241   :  { %v1155_v1 = vpack.c.bf16 %v1143_v0, %v3925_v61 }
 0x25d   :  { %v3190_v14 = vpop.f32.mrb[32].mxu0 }
 0x25e   :  { %v1276_v15 = vpop.f32.mrb[33].mxu0 }
 0x25f   :  { %v3191_v16 = vpop.f32.mrb[34].mxu0 }
 0x260   :  { %v1292_v17 = vpack.c.bf16 %v3191_v16, %v3190_v14  ;;  %v1279_v18 = vpop.f32.mrb[35].mxu0 }
 0x261   :  { %v1291_v19 = vpack.c.bf16 %v1279_v18, %v1276_v15  ;;  %v3538_v18 = vld [vmem:[%s4120_s2 + $0xd0] sm:$0xff]  }
 0x27d   :  { %v3964_v20 = vpop.f32.mrb[36].mxu0 }
 0x27e   :  { %v3966_v21 = vpop.f32.mrb[37].mxu0 }
 0x27f   :  { %v3968_v22 = vpop.f32.mrb[38].mxu0 }
 0x280   :  { %v1564_v23 = vpack.c.bf16 %v3968_v22, %v3964_v20  ;;  %v1551_v25 = vpop.f32.mrb[39].mxu0 }
 0x281   :  { %v1563_v27 = vpack.c.bf16 %v1551_v25, %v3966_v21 }
 0x29d   :  { %v3268_v41 = vpop.f32.mrb[40].mxu0 }
 0x29e   :  { %v1684_v42 = vpop.f32.mrb[41].mxu0 }
 0x29f   :  { %v3269_v43 = vpop.f32.mrb[42].mxu0 }
 0x2a0   :  { %v1700_v44 = vpack.c.bf16 %v3269_v43, %v3268_v41  ;;  %v1687_v45 = vpop.f32.mrb[43].mxu0  ;;  %v2464_v41 = vld [vmem:[%s4122_s4 + $0x18] sm:$0xff] }
 0x2a1   :  { %v1699_v46 = vpack.c.bf16 %v1687_v45, %v1684_v42 }
 0x2bd   :  { %v3320_v60 = vpop.f32.mrb[44].mxu0 }
 0x2be   :  { %v1956_v61 = vpop.f32.mrb[45].mxu0 }
 0x2bf   :  { %v3321_v62 = vpop.f32.mrb[46].mxu0 }
 0x2c0   :  { %v1959_v0 = vpop.f32.mrb[47].mxu0 }
 0x2f7   :  { %v3086_v3 = vpop.f32.mrb[8].mxu1 }
 0x2f8   :  { %v732_v5 = vpop.f32.mrb[9].mxu1 }
 0x2f9   :  { %v3087_v6 = vpop.f32.mrb[10].mxu1 }
 0x2fa   :  { %v748_v7 = vpack.c.bf16 %v3087_v6, %v3086_v3  ;;  %v735_v8 = vpop.f32.mrb[11].mxu1  ;;  %v3540_v3 = vld [vmem:[%s4120_s2 + $0xf0] sm:$0xff]   ;;  %v4056_v6 = vpop.f32.mrb[48].mxu0 }
 0x2fb   :  { %v747_v9 = vpack.c.bf16 %v735_v8, %v732_v5  ;;  %v3541_v5 = vld [vmem:[%s4120_s2 + $0xf8] sm:$0xff]   ;;  %3396 = vmatprep.mubr.bf16.mxu0 %v3540_v3 }
 0x2fc   :  { %3397 = vmatmul.mubr.bf16.vlgmr.msra.gmra.mrb[52].mxu0 %v3541_v5 }
 0x2fd   :  { %3090 = vmatprep.mubr.msk.bf16.mxu1 %vm428_vm1, %v747_v9 }
 0x2fe   :  { %3091 = vmatmul.mubr.msk.bf16.vlgmr.msra.gmra.mrb[4].mxu1 %vm428_vm1, %v748_v7  ;;  %v2228_v7 = vpop.f32.mrb[49].mxu0 }
 0x2ff   :  { %3115 = vmatpush3.bf16.msra.mxu1 %v3523_v51  ;;  %3116 = vmatprep.mubr.msk.bf16.mxu1 %vm428_vm1, %v883_v59  ;;  %v3537_v59 = vld [vmem:[%s4121_s3 + $0x60] sm:$0xff]   ;;  %v3373_v8 = vpop.f32.mrb[50].mxu0 }
 0x300   :  { %3120 = vmatprep.subr.bf16.mxu1 %v3632_v26  ;;  %v2244_v9 = vpack.c.bf16 %v3373_v8, %v4056_v6 }
 0x30a   :  { %3117 = vmatmul.mubr.msk.bf16.vlgmr.msra.gmra.mrb[4].mxu1 %vm428_vm1, %v884_v57  ;;  %v3536_v57 = vld [vmem:[%s4121_s3 + $0x58] sm:$0xff]  }
 0x30b   :  { %3121 = vmatpush3.bf16.msra.mxu1 %v3632_v26  ;;  %3136 = vmatprep.mubr.bf16.mxu1 %v3524_v10  ;;  %v2231_v10 = vpop.f32.mrb[51].mxu0 }
 0x30c   :  { %3122 = vmatprep.subr.bf16.mxu1 %v3630_v24 }
 0x30f   :  { %3123 = vmatpush3.bf16.msra.mxu1 %v3630_v24 }
 0x310   :  { %3124 = vmatprep.subr.bf16.mxu1 %v3644_v40 }
 0x313   :  { %3125 = vmatpush3.bf16.msra.mxu1 %v3644_v40 }
 0x314   :  { %3126 = vmatprep.subr.bf16.mxu1 %v3640_v38 }
 0x317   :  { %3127 = vmatpush3.bf16.msra.mxu1 %v3640_v38 }
 0x318   :  { %3128 = vmatprep.subr.bf16.mxu1 %v3656_v54 }
 0x31b   :  { %3129 = vmatpush3.bf16.msra.mxu1 %v3656_v54 }
 0x31c   :  { %3130 = vmatprep.subr.bf16.mxu1 %v3652_v52 }
 0x31f   :  { %3131 = vmatpush3.bf16.msra.mxu1 %v3652_v52 }
 0x320   :  { %3132 = vmatprep.subr.bf16.mxu1 %v3668_v4 }
 0x323   :  { %3133 = vmatpush3.bf16.msra.mxu1 %v3668_v4 }
 0x324   :  { %3134 = vmatprep.subr.bf16.mxu1 %v3664_v2 }
 0x327   :  { %3135 = vmatpush3.bf16.msra.mxu1 %v3664_v2 }
 0x328   :  { %3140 = vmatprep.subr.bf16.mxu1 %v3526_v11 }
 0x32a   :  { %3137 = vmatmul.mubr.bf16.vlgmr.msra.gmra.mrb[12].mxu1 %v3525_v12 }
 0x32b   :  { %3141 = vmatpush3.bf16.msra.mxu1 %v3526_v11  ;;  %v2243_v11 = vpack.c.bf16 %v2231_v10, %v2228_v7 }
 0x32c   :  { %3166 = vmatprep.subr.bf16.mxu1 %v3527_v13 }
 0x3fd   :  { %v3138_v28 = vpop.f32.mrb[12].mxu1 }
 0x3fe   :  { %v1004_v29 = vpop.f32.mrb[13].mxu1 }
 0x3ff   :  { %v3139_v30 = vpop.f32.mrb[14].mxu1 }
 0x400   :  { %v1020_v31 = vpack.c.bf16 %v3139_v30, %v3138_v28  ;;  %v1007_v32 = vpop.f32.mrb[15].mxu1  ;;  %v3544_v28 = vld [vmem:[%s4121_s3 + $0x78] sm:$0xff]   ;;  %v3547_v30 = vmov 0.0  }
 0x401   :  { %v1019_v33 = vpack.c.bf16 %v1007_v32, %v1004_v29  ;;  %v3545_v29 = vmov 0.0|0.0  }
 0x403   :  { %3142 = vmatprep.mubr.msk.bf16.mxu1 %vm428_vm1, %v1019_v33 }
 0x404   :  { %3143 = vmatmul.mubr.msk.bf16.vlgmr.msra.gmra.mrb[4].mxu1 %vm428_vm1, %v1020_v31 }
 0x405   :  { %3167 = vmatpush3.bf16.msra.mxu1 %v3527_v13  ;;  %3168 = vmatprep.mubr.msk.bf16.mxu1 %vm428_vm1, %v1155_v1  ;;  %v1971_v1 = vpack.c.bf16 %v1959_v0, %v1956_v61 }
 0x406   :  { %3192 = vmatprep.subr.bf16.mxu1 %v3528_v34 }
 0x410   :  { %3169 = vmatmul.mubr.msk.bf16.vlgmr.msra.gmra.mrb[4].mxu1 %vm428_vm1, %v1156_v63  ;;  %v1972_v63 = vpack.c.bf16 %v3321_v62, %v3320_v60 }
 0x411   :  { %3193 = vmatpush3.bf16.msra.mxu1 %v3528_v34  ;;  %3194 = vmatprep.mubr.msk.bf16.mxu1 %vm428_vm1, %v1291_v19 }
 0x412   :  { %3198 = vmatprep.subr.bf16.mxu1 %v3632_v26 }
 0x41c   :  { %3195 = vmatmul.mubr.msk.bf16.vlgmr.msra.gmra.mrb[4].mxu1 %vm428_vm1, %v1292_v17 }
 0x41d   :  { %3199 = vmatpush3.bf16.msra.mxu1 %v3632_v26  ;;  %3214 = vmatprep.mubr.bf16.mxu1 %v3529_v35 }
 0x41e   :  { %3200 = vmatprep.subr.bf16.mxu1 %v3630_v24 }
 0x421   :  { %3201 = vmatpush3.bf16.msra.mxu1 %v3630_v24 }
 0x422   :  { %3202 = vmatprep.subr.bf16.mxu1 %v3644_v40 }
 0x425   :  { %3203 = vmatpush3.bf16.msra.mxu1 %v3644_v40 }
 0x426   :  { %3204 = vmatprep.subr.bf16.mxu1 %v3640_v38 }
 0x429   :  { %3205 = vmatpush3.bf16.msra.mxu1 %v3640_v38 }
 0x42a   :  { %3206 = vmatprep.subr.bf16.mxu1 %v3656_v54 }
 0x42d   :  { %3207 = vmatpush3.bf16.msra.mxu1 %v3656_v54 }
 0x42e   :  { %3208 = vmatprep.subr.bf16.mxu1 %v3652_v52 }
 0x431   :  { %3209 = vmatpush3.bf16.msra.mxu1 %v3652_v52 }
 0x432   :  { %3210 = vmatprep.subr.bf16.mxu1 %v3668_v4 }
 0x435   :  { %3211 = vmatpush3.bf16.msra.mxu1 %v3668_v4 }
 0x436   :  { %3212 = vmatprep.subr.bf16.mxu1 %v3664_v2 }
 0x439   :  { %3213 = vmatpush3.bf16.msra.mxu1 %v3664_v2 }
 0x43a   :  { %3218 = vmatprep.subr.bf16.mxu1 %v3531_v36 }
 0x43c   :  { %3215 = vmatmul.mubr.bf16.vlgmr.msra.gmra.mrb[16].mxu1 %v3530_v37  ;;  %v2463_v37 = vld [vmem:[%s4122_s4 + $0x10] sm:$0xff] }
 0x43d   :  { %3219 = vmatpush3.bf16.msra.mxu1 %v3531_v36 }
 0x43e   :  { %3244 = vmatprep.subr.bf16.mxu1 %v3532_v39 }
 0x50f   :  { %v3216_v47 = vpop.f32.mrb[16].mxu1 }
 0x510   :  { %v1412_v48 = vpop.f32.mrb[17].mxu1 }
 0x511   :  { %v3217_v49 = vpop.f32.mrb[18].mxu1 }
 0x512   :  { %v1428_v50 = vpack.c.bf16 %v3217_v49, %v3216_v47  ;;  %v1415_v51 = vpop.f32.mrb[19].mxu1 }
 0x513   :  { %v1427_v53 = vpack.c.bf16 %v1415_v51, %v1412_v48 }
 0x515   :  { %3220 = vmatprep.mubr.msk.bf16.mxu1 %vm428_vm1, %v1427_v53 }
 0x516   :  { %3221 = vmatmul.mubr.msk.bf16.vlgmr.msra.gmra.mrb[4].mxu1 %vm428_vm1, %v1428_v50 }
 0x517   :  { %3245 = vmatpush3.bf16.msra.mxu1 %v3532_v39  ;;  %3246 = vmatprep.mubr.msk.bf16.mxu1 %vm428_vm1, %v1563_v27 }
 0x518   :  { %3270 = vmatprep.subr.bf16.mxu1 %v3533_v55 }
 0x522   :  { %3247 = vmatmul.mubr.msk.bf16.vlgmr.msra.gmra.mrb[4].mxu1 %vm428_vm1, %v1564_v23 }
 0x523   :  { %3271 = vmatpush3.bf16.msra.mxu1 %v3533_v55  ;;  %3272 = vmatprep.mubr.msk.bf16.mxu1 %vm428_vm1, %v1699_v46  ;;  %v2462_v46 = vld [vmem:[%s4122_s4 + $0x8] sm:$0xff] }
 0x524   :  { %3276 = vmatprep.subr.bf16.mxu1 %v3632_v26 }
 0x52e   :  { %3273 = vmatmul.mubr.msk.bf16.vlgmr.msra.gmra.mrb[4].mxu1 %vm428_vm1, %v1700_v44  ;;  %v2461_v44 = vld [vmem:[%s4122_s4] sm:$0xff] }
 0x52f   :  { %3277 = vmatpush3.bf16.msra.mxu1 %v3632_v26  ;;  %3292 = vmatprep.mubr.bf16.mxu1 %v3534_v56 }
 0x530   :  { %3278 = vmatprep.subr.bf16.mxu1 %v3630_v24 }
 0x533   :  { %3279 = vmatpush3.bf16.msra.mxu1 %v3630_v24 }
 0x534   :  { %3280 = vmatprep.subr.bf16.mxu1 %v3644_v40 }
 0x537   :  { %3281 = vmatpush3.bf16.msra.mxu1 %v3644_v40 }
 0x538   :  { %3282 = vmatprep.subr.bf16.mxu1 %v3640_v38 }
 0x53b   :  { %3283 = vmatpush3.bf16.msra.mxu1 %v3640_v38 }
 0x53c   :  { %3284 = vmatprep.subr.bf16.mxu1 %v3656_v54 }
 0x53f   :  { %3285 = vmatpush3.bf16.msra.mxu1 %v3656_v54 }
 0x540   :  { %3286 = vmatprep.subr.bf16.mxu1 %v3652_v52 }
 0x543   :  { %3287 = vmatpush3.bf16.msra.mxu1 %v3652_v52 }
 0x544   :  { %3288 = vmatprep.subr.bf16.mxu1 %v3668_v4 }
 0x547   :  { %3289 = vmatpush3.bf16.msra.mxu1 %v3668_v4 }
 0x548   :  { %3290 = vmatprep.subr.bf16.mxu1 %v3664_v2 }
 0x54b   :  { %3291 = vmatpush3.bf16.msra.mxu1 %v3664_v2 }
 0x54c   :  { %3296 = vmatprep.subr.bf16.mxu1 %v3536_v57 }
 0x54e   :  { %3293 = vmatmul.mubr.bf16.vlgmr.msra.gmra.mrb[20].mxu1 %v3535_v58 }
 0x54f   :  { %3297 = vmatpush3.bf16.msra.mxu1 %v3536_v57  ;;  %v2469_v57 = vld [vmem:[%s4123_s5] sm:$0x3] }
 0x550   :  { %3322 = vmatprep.subr.bf16.mxu1 %v3537_v59 }
 0x621   :  { %v3294_v12 = vpop.f32.mrb[20].mxu1 }
 0x622   :  { %v1820_v13 = vpop.f32.mrb[21].mxu1 }
 0x623   :  { %v3295_v14 = vpop.f32.mrb[22].mxu1 }
 0x624   :  { %v1836_v15 = vpack.c.bf16 %v3295_v14, %v3294_v12  ;;  %v1823_v16 = vpop.f32.mrb[23].mxu1 }
 0x625   :  { %v1835_v17 = vpack.c.bf16 %v1823_v16, %v1820_v13 }
 0x627   :  { %3298 = vmatprep.mubr.msk.bf16.mxu1 %vm428_vm1, %v1835_v17 }
 0x628   :  { %3299 = vmatmul.mubr.msk.bf16.vlgmr.msra.gmra.mrb[4].mxu1 %vm428_vm1, %v1836_v15 }
 0x629   :  { %3323 = vmatpush3.bf16.msra.mxu1 %v3537_v59  ;;  %3324 = vmatprep.mubr.msk.bf16.mxu1 %vm428_vm1, %v1971_v1 }
 0x62a   :  { %3328 = vmatprep.subr.bf16.mxu1 %v3632_v26 }
 0x634   :  { %3325 = vmatmul.mubr.msk.bf16.vlgmr.msra.gmra.mrb[4].mxu1 %vm428_vm1, %v1972_v63 }
 0x635   :  { %3329 = vmatpush3.bf16.msra.mxu1 %v3632_v26  ;;  %3344 = vmatprep.mubr.bf16.mxu1 %v3538_v18  ;;  %v3539_v26 = vld [vmem:[%s4120_s2 + $0xd8] sm:$0xff]  }
 0x636   :  { %3330 = vmatprep.subr.bf16.mxu1 %v3630_v24 }
 0x639   :  { %3331 = vmatpush3.bf16.msra.mxu1 %v3630_v24  ;;  %v3542_v24 = vld [vmem:[%s4121_s3 + $0x68] sm:$0xff]  }
 0x63a   :  { %3332 = vmatprep.subr.bf16.mxu1 %v3644_v40 }
 0x63d   :  { %3333 = vmatpush3.bf16.msra.mxu1 %v3644_v40  ;;  %v3398_v40 = vpop.f32.mrb[52].mxu0 }
 0x63e   :  { %3334 = vmatprep.subr.bf16.mxu1 %v3640_v38 }
 0x641   :  { %3335 = vmatpush3.bf16.msra.mxu1 %v3640_v38  ;;  %v3543_v38 = vld [vmem:[%s4121_s3 + $0x70] sm:$0xff]  }
 0x642   :  { %3336 = vmatprep.subr.bf16.mxu1 %v3656_v54 }
 0x645   :  { %3337 = vmatpush3.bf16.msra.mxu1 %v3656_v54 }
 0x646   :  { %3338 = vmatprep.subr.bf16.mxu1 %v3652_v52 }
 0x649   :  { %3339 = vmatpush3.bf16.msra.mxu1 %v3652_v52  ;;  %v2364_v52 = vpop.f32.mrb[53].mxu0 }
 0x64a   :  { %3340 = vmatprep.subr.bf16.mxu1 %v3668_v4  ;;  %v3399_v54 = vpop.f32.mrb[54].mxu0 }
 0x64b   :  { %v2367_v19 = vpop.f32.mrb[55].mxu0 }
 0x64c   :  { %v2379_v20 = vpack.c.bf16 %v2367_v19, %v2364_v52 }
 0x64d   :  { %3341 = vmatpush3.bf16.msra.mxu1 %v3668_v4  ;;  %v2380_v4 = vpack.c.bf16 %v3399_v54, %v3398_v40 }
 0x64e   :  { %3342 = vmatprep.subr.bf16.mxu1 %v3664_v2 }
 0x651   :  { %3343 = vmatpush3.bf16.msra.mxu1 %v3664_v2 }
 0x652   :  { %3348 = vmatprep.subr.bf16.mxu1 %v3542_v24 }
 0x654   :  { %3345 = vmatmul.mubr.bf16.vlgmr.msra.gmra.mrb[24].mxu1 %v3539_v26 }
 0x655   :  { %3349 = vmatpush3.bf16.msra.mxu1 %v3542_v24 }
 0x656   :  { %3374 = vmatprep.subr.bf16.mxu1 %v3543_v38 }
 0x727   :  { %v3346_v21 = vpop.f32.mrb[24].mxu1 }
 0x728   :  { %v2092_v22 = vpop.f32.mrb[25].mxu1 }
 0x729   :  { %v3347_v23 = vpop.f32.mrb[26].mxu1 }
 0x72a   :  { %v2108_v25 = vpack.c.bf16 %v3347_v23, %v3346_v21  ;;  %v2095_v27 = vpop.f32.mrb[27].mxu1 }
 0x72b   :  { %v2107_v2 = vpack.c.bf16 %v2095_v27, %v2092_v22 }
 0x72d   :  { %3350 = vmatprep.mubr.msk.bf16.mxu1 %vm428_vm1, %v2107_v2 }
 0x72e   :  { %3351 = vmatmul.mubr.msk.bf16.vlgmr.msra.gmra.mrb[4].mxu1 %vm428_vm1, %v2108_v25 }
 0x72f   :  { %3375 = vmatpush3.bf16.msra.mxu1 %v3543_v38  ;;  %3376 = vmatprep.mubr.msk.bf16.mxu1 %vm428_vm1, %v2243_v11 }
 0x730   :  { %3400 = vmatprep.subr.bf16.mxu1 %v3544_v28 }
 0x73a   :  { %3377 = vmatmul.mubr.msk.bf16.vlgmr.msra.gmra.mrb[4].mxu1 %vm428_vm1, %v2244_v9 }
 0x73b   :  { %3401 = vmatpush3.bf16.msra.mxu1 %v3544_v28  ;;  %3402 = vmatprep.mubr.msk.bf16.mxu1 %vm428_vm1, %v2379_v20 }
 0x73c   :  { %3417 = vmatprep.subr.bf16.mxu1 %v3545_v29 }
 0x746   :  { %3403 = vmatmul.mubr.msk.bf16.vlgmr.msra.gmra.mrb[4].mxu1 %vm428_vm1, %v2380_v4 }
 0x747   :  { %3414 = vmatprep.mubr.msk.f32.mxu1 %vm3546_vm2, %v3547_v30 }
 0x819   :  { %v3404_v31 = vpop.f32.mrb[4].mxu1 }
 0x81a   :  { %vm2451_vm3 = vcmp.ge.f32.partialorder %v3404_v31, 0.0  ;;  %v2455_v32 = vmul.f32 0.2, %v3404_v31  ;;  %v2430_v33 = vpop.f32.mrb[5].mxu1 }
 0x81b   :  { %vm2449_vm4 = vcmp.ge.f32.partialorder %v2430_v33, 0.0  ;;  %v2453_v34 = vmul.f32 0.2, %v2430_v33  ;;  %v3405_v35 = vpop.f32.mrb[6].mxu1 }
 0x81c   :  { %v2459_v36 = vsel %vm2451_vm3, %v3404_v31, %v2455_v32  ;;  %vm2452_vm5 = vcmp.ge.f32.partialorder %v3405_v35, 0.0  ;;  %v2456_v39 = vmul.f32 0.2, %v3405_v35  ;;  %v2433_v42 = vpop.f32.mrb[7].mxu1 }
 0x81d   :  { %v2457_v43 = vsel %vm2449_vm4, %v2430_v33, %v2453_v34  ;;  %vm2450_vm6 = vcmp.ge.f32.partialorder %v2433_v42, 0.0  ;;  %v2454_v45 = vmul.f32 0.2, %v2433_v42  ;;  %v2467_v48 = vmul.f32 %v2463_v37, %v2459_v36 }
 0x81e   :  { %v2460_v47 = vsel %vm2452_vm5, %v3405_v35, %v2456_v39  ;;  %v2465_v51 = vmul.f32 %v2461_v44, %v2457_v43 }
 0x81f   :  { %v2468_v49 = vmul.f32 %v2464_v41, %v2460_v47  ;;  %v2458_v50 = vsel %vm2450_vm6, %v2433_v42, %v2454_v45 }
 0x820   :  { %v2466_v53 = vmul.f32 %v2462_v46, %v2458_v50 }
 0x821   :  { %v3421_v55 = vpack.c.bf16 %v2468_v49, %v2467_v48 }
 0x822   :  { %v3418_v56 = vpack.c.bf16 %v2466_v53, %v2465_v51 }
 0x824   :  { %3419 = vmatpush3.bf16.msra.mxu1 %v3418_v56 }
 0x825   :  { %3420 = vmatprep.subr.bf16.mxu1 %v3545_v29 }
 0x828   :  { %3422 = vmatpush3.bf16.msra.mxu1 %v3421_v55 }
 0x82b   :  { %3415 = vmatmul.mubr.msk.f32.vlgmr.msra.gmra.mrb[28].mxu1 %vm2470_vm7, %v2469_v57 }
 0x8fe   :  { %v2540_v58 = vpop.f32.mrb[28].mxu1 }
 0x8ff   :  { %v3416_v59 = vpop.f32.mrb[29].mxu1  ;;  %v2545_v60 = vsel %vm2544_vm8, %v2540_v58, 0.0 }
 0x900   :  { %2546 = vadd.xlane.f32.xlu0 %v2545_v60 }
 0x98d   :  { %v2547_v61 = vpop.xlane.xlu0 %2546 }
 0x98e   :  { %2549 = vst.msk [vmem:[%s4124_s6] sm:$0x3] %vm2548_vm9, %v2547_v61 }

</bundles_post_ra>
